<compile_context>
chip_gen: v5e
topology: v5e:2x2
jax: 0.10.0
libtpu: 0.0.40
codegen_flags: <defaults>
</compile_context>

<pallas_src>
import functools
import math

import jax
import jax.numpy as jnp
from jax.experimental import pallas as pl
from jax.experimental.pallas import tpu as pltpu

VMEM = pl.BlockSpec(memory_space=pltpu.MemorySpace.VMEM)


# ------------------------------ Fused Pallas kernel ------------------------------

def _roberta_fused_kernel(
        x_ref, mask_ref, len_ref,
        emb_g_ref, emb_b_ref,
        wqkv_ref, bqkv_ref, wo_ref, bo_ref,
        ln1_g_ref, ln1_b_ref, wi_ref, bi_ref, wf_ref, bf_ref,
        ln2_g_ref, ln2_b_ref,
        cls_w_ref, cls_b_ref, op_w_ref, op_b_ref,
        hwa_ref, hwb_ref, hb_ref,
        o_ref, *, B, S, H, nh, L, eps):
    """Embedding LN -> L fused encoder layers -> classification head, one kernel."""
    dh = H // nh

    def ln(v, g, b):
        mu = jnp.mean(v, axis=-1, keepdims=True)
        var = jnp.mean(jnp.square(v - mu), axis=-1, keepdims=True)
        return (v - mu) * jax.lax.rsqrt(var + eps) * g + b

    # --- embedding LayerNorm (f32) ---
    x = x_ref[...].astype(jnp.float32)                          # [B*S, H]
    x = ln(x, emb_g_ref[...], emb_b_ref[...])

    # --- additive attention mask, built once on the VPU, hoisted out of all loops ---
    bias = (1.0 - mask_ref[...]) * jnp.float32(-1e9)             # [B, S]
    bias = bias[:, None, :]                                      # [B, 1, S]

    # --- encoder layers (static unroll; weights statically indexed from stacks) ---
    for l in range(L):
        x_bf = x.astype(jnp.bfloat16)
        # fused QKV projection: one bf16 [H, 3H] matmul (scale folded into wq/bq)
        qkv = jnp.dot(x_bf, wqkv_ref[l],
                      preferred_element_type=jnp.float32) + bqkv_ref[l]   # [B*S, 3H]

        attn = jnp.zeros((B * S, H), jnp.float32)
        for h in range(nh):
            q = qkv[:, h * dh:(h + 1) * dh].reshape(B, S, dh).astype(jnp.bfloat16)
            k = qkv[:, H + h * dh:H + (h + 1) * dh].reshape(B, S, dh).astype(jnp.bfloat16)
            v = qkv[:, 2 * H + h * dh:2 * H + (h + 1) * dh].reshape(B, S, dh).astype(jnp.bfloat16)
            s = jnp.einsum("bqd,bkd->bqk", q, k,
                           preferred_element_type=jnp.float32) + bias     # [B, S, S]
            m = jnp.max(s, axis=-1, keepdims=True)
            e = jnp.exp(s - m)
            p = e * pl.reciprocal(jnp.sum(e, axis=-1, keepdims=True), approx=True)
            ctx = jnp.einsum("bqk,bkd->bqd", p.astype(jnp.bfloat16), v,
                             preferred_element_type=jnp.float32)          # [B, S, dh]
            # per-head out-projection block accumulated in f32 (no lane concat)
            attn = attn + jnp.dot(ctx.reshape(B * S, dh).astype(jnp.bfloat16),
                                  wo_ref[l * nh + h],
                                  preferred_element_type=jnp.float32)
        attn = attn + bo_ref[l]
        y1 = ln(attn + x, ln1_g_ref[l], ln1_b_ref[l])

        # FFN (+GELU, f32) + residual + LN2
        hmid = jnp.dot(y1.astype(jnp.bfloat16), wi_ref[l],
                       preferred_element_type=jnp.float32) + bi_ref[l]
        hmid = jax.nn.gelu(hmid, approximate=True)               # TODO(synk): erf GELU
        ff = jnp.dot(hmid.astype(jnp.bfloat16), wf_ref[l],
                     preferred_element_type=jnp.float32) + bf_ref[l]
        x = ln(ff + y1, ln2_g_ref[l], ln2_b_ref[l])

    # --- classification head ---
    # CLS token gather via static slice (no one-hot matmul).
    cls = jax.lax.slice_in_dim(x.reshape(B, S, H), 0, 1, axis=1).reshape(B, H)
    hcls = jnp.tanh(jnp.dot(cls.astype(jnp.bfloat16), cls_w_ref[...],
                            preferred_element_type=jnp.float32) + cls_b_ref[...])
    logits = jnp.dot(hcls.astype(jnp.bfloat16), op_w_ref[...],
                     preferred_element_type=jnp.float32) + op_b_ref[...]   # [B, nl]

    # dropout(0.3) in eval mode = identity.
    # cat([logits, lengths], dim=1) @ W^T + b, with W split row-wise;
    # the length column is a plain VPU broadcast multiply (no K=1 MXU push).
    y = jnp.dot(logits, hwa_ref[...], preferred_element_type=jnp.float32)  # [B, 1]
    y = y + len_ref[...] * hwb_ref[...]
    o_ref[...] = (y + hb_ref[...]).astype(o_ref.dtype)


# --------------------------- Model config & params ---------------------------

class Cfg:
    vocab = 100
    hidden = 32
    layers = 2
    heads = 4
    inter = 64
    max_pos = 40
    num_labels = 3   # twitter-roberta sentiment model has 3 labels -> Linear(3+1, 1)
    pad_id = 1


def init_params(key, cfg):
    H, I = cfg.hidden, cfg.inter
    keys = jax.random.split(key, 64)
    ki = iter(range(len(keys)))

    def nrm(shape):
        return 0.02 * jax.random.normal(keys[next(ki)], shape, jnp.float32)

    def zeros(shape):
        return jnp.zeros(shape, jnp.float32)

    def ones(shape):
        return jnp.ones(shape, jnp.float32)

    p = {
        "word_emb": nrm((cfg.vocab, H)),
        "pos_emb": nrm((cfg.max_pos, H)),
        "type_emb": nrm((1, H)),
        "emb_ln_g": ones((H,)), "emb_ln_b": zeros((H,)),
        "cls_w": nrm((H, H)), "cls_b": zeros((H,)),
        "outproj_w": nrm((H, cfg.num_labels)), "outproj_b": zeros((cfg.num_labels,)),
        "head_w": nrm((cfg.num_labels + 1, 1)), "head_b": zeros((1,)),
        "layers": [],
    }
    for _ in range(cfg.layers):
        p["layers"].append({
            "wq": nrm((H, H)), "bq": zeros((H,)),
            "wk": nrm((H, H)), "bk": zeros((H,)),
            "wv": nrm((H, H)), "bv": zeros((H,)),
            "wo": nrm((H, H)), "bo": zeros((H,)),
            "ln1_g": ones((H,)), "ln1_b": zeros((H,)),
            "wi": nrm((H, I)), "bi": zeros((I,)),
            "wf": nrm((I, H)), "bf": zeros((H,)),
            "ln2_g": ones((H,)), "ln2_b": zeros((H,)),
        })
    return p


# ------------------------------- Forward pass --------------------------------

def roberta_classifier_forward(params, ids, mask, lengths, cfg, eps=1e-5):
    B, S = ids.shape
    H, nh, L, I, nl = cfg.hidden, cfg.heads, cfg.layers, cfg.inter, cfg.num_labels
    dh = H // nh
    scale = 1.0 / math.sqrt(dh)
    Ls = params["layers"]

    # --- embeddings (table gathers stay in plain JAX) ---
    mask_i = mask.astype(jnp.int32)
    pos_ids = jnp.cumsum(mask_i, axis=1) * mask_i + cfg.pad_id   # RoBERTa position ids
    x = (jnp.take(params["word_emb"], ids, axis=0)
         + jnp.take(params["pos_emb"], pos_ids, axis=0)
         + params["type_emb"][0])
    x = x.reshape(B * S, H).astype(jnp.float32)
    # embedding dropout: eval mode -> identity

    # --- stacked / fused weights (built once; scale folded into q; matmul weights bf16) ---
    wqkv = jnp.stack([jnp.concatenate([lp["wq"] * scale, lp["wk"], lp["wv"]], axis=1)
                      for lp in Ls]).astype(jnp.bfloat16)                     # [L, H, 3H]
    bqkv = jnp.stack([jnp.concatenate([lp["bq"] * scale, lp["bk"], lp["bv"]])
                      for lp in Ls]).reshape(L, 1, 3 * H)                     # [L, 1, 3H]
    wo = jnp.stack([lp["wo"].reshape(nh, dh, H) for lp in Ls]
                   ).reshape(L * nh, dh, H).astype(jnp.bfloat16)              # [L*nh, dh, H]
    bo = jnp.stack([lp["bo"] for lp in Ls]).reshape(L, 1, H)
    ln1_g = jnp.stack([lp["ln1_g"] for lp in Ls]).reshape(L, 1, H)
    ln1_b = jnp.stack([lp["ln1_b"] for lp in Ls]).reshape(L, 1, H)
    wi = jnp.stack([lp["wi"] for lp in Ls]).astype(jnp.bfloat16)              # [L, H, I]
    bi = jnp.stack([lp["bi"] for lp in Ls]).reshape(L, 1, I)
    wf = jnp.stack([lp["wf"] for lp in Ls]).astype(jnp.bfloat16)              # [L, I, H]
    bf = jnp.stack([lp["bf"] for lp in Ls]).reshape(L, 1, H)
    ln2_g = jnp.stack([lp["ln2_g"] for lp in Ls]).reshape(L, 1, H)
    ln2_b = jnp.stack([lp["ln2_b"] for lp in Ls]).reshape(L, 1, H)

    hwa = params["head_w"][:nl, :]                                            # [nl, 1]
    hwb = params["head_w"][nl:, :].reshape(1, 1)                              # length col
    hb = params["head_b"].reshape(1, 1)

    # --- single fused pallas_call for the whole forward ---
    kernel = functools.partial(_roberta_fused_kernel,
                               B=B, S=S, H=H, nh=nh, L=L, eps=eps)
    return pl.pallas_call(
        kernel,
        out_shape=jax.ShapeDtypeStruct((B, 1), jnp.float32),
        in_specs=[VMEM] * 24,
        out_specs=VMEM,
    )(x, mask.astype(jnp.float32), lengths.astype(jnp.float32).reshape(B, 1),
      params["emb_ln_g"].reshape(1, H), params["emb_ln_b"].reshape(1, H),
      wqkv, bqkv, wo, bo,
      ln1_g, ln1_b, wi, bi, wf, bf,
      ln2_g, ln2_b,
      params["cls_w"].astype(jnp.bfloat16), params["cls_b"].reshape(1, H),
      params["outproj_w"].astype(jnp.bfloat16), params["outproj_b"].reshape(1, nl),
      hwa, hwb, hb)                                                            # [B, 1]


# ----------------------------------- Main ------------------------------------

if __name__ == "__main__":
    cfg = Cfg()
    key = jax.random.PRNGKey(0)
    pkey, dkey = jax.random.split(key)
    params = init_params(pkey, cfg)

    B, S = 2, 8
    k1, _ = jax.random.split(dkey)
    ids = jax.random.randint(k1, (B, S), 2, cfg.vocab, dtype=jnp.int32)
    ids = ids.at[:, 0].set(0)                    # <s> token
    mask = jnp.ones((B, S), jnp.int32)
    mask = mask.at[1, 6:].set(0)                 # pad the tail of example 1
    ids = jnp.where(mask == 1, ids, cfg.pad_id)
    lengths = jnp.array([8.0, 6.0], jnp.float32)

    out = roberta_classifier_forward(params, ids, mask, lengths, cfg)
    out = jax.block_until_ready(out)
    assert out.shape == (B, 1) and out.dtype == jnp.float32
    assert bool(jnp.all(jnp.isfinite(out)))
    print("KERNEL_OK")
</pallas_src>

<mosaic_0001>
module attributes {stable_mosaic.version = 11 : i64} {
  func.func @_roberta_fused_kernel(%arg0: memref<16x32xf32, #tpu.memory_space<vmem>>, %arg1: memref<2x8xf32, #tpu.memory_space<vmem>>, %arg2: memref<2x1xf32, #tpu.memory_space<vmem>>, %arg3: memref<1x32xf32, #tpu.memory_space<vmem>>, %arg4: memref<1x32xf32, #tpu.memory_space<vmem>>, %arg5: memref<2x32x96xbf16, #tpu.memory_space<vmem>>, %arg6: memref<2x1x96xf32, #tpu.memory_space<vmem>>, %arg7: memref<8x8x32xbf16, #tpu.memory_space<vmem>>, %arg8: memref<2x1x32xf32, #tpu.memory_space<vmem>>, %arg9: memref<2x1x32xf32, #tpu.memory_space<vmem>>, %arg10: memref<2x1x32xf32, #tpu.memory_space<vmem>>, %arg11: memref<2x32x64xbf16, #tpu.memory_space<vmem>>, %arg12: memref<2x1x64xf32, #tpu.memory_space<vmem>>, %arg13: memref<2x64x32xbf16, #tpu.memory_space<vmem>>, %arg14: memref<2x1x32xf32, #tpu.memory_space<vmem>>, %arg15: memref<2x1x32xf32, #tpu.memory_space<vmem>>, %arg16: memref<2x1x32xf32, #tpu.memory_space<vmem>>, %arg17: memref<32x32xbf16, #tpu.memory_space<vmem>>, %arg18: memref<1x32xf32, #tpu.memory_space<vmem>>, %arg19: memref<32x3xbf16, #tpu.memory_space<vmem>>, %arg20: memref<1x3xf32, #tpu.memory_space<vmem>>, %arg21: memref<3x1xf32, #tpu.memory_space<vmem>>, %arg22: memref<1x1xf32, #tpu.memory_space<vmem>>, %arg23: memref<1x1xf32, #tpu.memory_space<vmem>>, %arg24: memref<2x1xf32, #tpu.memory_space<vmem>>) attributes {dimension_semantics = [], scalar_prefetch = 0 : i64, scratch_operands = 0 : i64, tpu.core_type = #tpu.core_type<tc>} {
    %c0 = arith.constant 0 : index
    %c0_0 = arith.constant 0 : index
    %0 = vector.load %arg0[%c0, %c0_0] : memref<16x32xf32, #tpu.memory_space<vmem>>, vector<16x32xf32>
    %c0_1 = arith.constant 0 : index
    %c0_2 = arith.constant 0 : index
    %1 = vector.load %arg3[%c0_1, %c0_2] : memref<1x32xf32, #tpu.memory_space<vmem>>, vector<1x32xf32>
    %c0_3 = arith.constant 0 : index
    %c0_4 = arith.constant 0 : index
    %2 = vector.load %arg4[%c0_3, %c0_4] : memref<1x32xf32, #tpu.memory_space<vmem>>, vector<1x32xf32>
    %cst = arith.constant dense<0.000000e+00> : vector<16xf32>
    %3 = vector.multi_reduction <add>, %0, %cst [1] : vector<16x32xf32> to vector<16xf32>
    %4 = vector.shape_cast %3 : vector<16xf32> to vector<16x1xf32>
    %cst_5 = arith.constant 3.200000e+01 : f32
    %5 = vector.broadcast %cst_5 : f32 to vector<16x1xf32>
    %6 = arith.divf %4, %5 : vector<16x1xf32>
    %7 = vector.broadcast %6 : vector<16x1xf32> to vector<16x32xf32>
    %8 = arith.subf %0, %7 : vector<16x32xf32>
    %9 = arith.mulf %8, %8 : vector<16x32xf32>
    %cst_6 = arith.constant dense<0.000000e+00> : vector<16xf32>
    %10 = vector.multi_reduction <add>, %9, %cst_6 [1] : vector<16x32xf32> to vector<16xf32>
    %11 = vector.shape_cast %10 : vector<16xf32> to vector<16x1xf32>
    %cst_7 = arith.constant 3.200000e+01 : f32
    %12 = vector.broadcast %cst_7 : f32 to vector<16x1xf32>
    %13 = arith.divf %11, %12 : vector<16x1xf32>
    %14 = vector.broadcast %6 : vector<16x1xf32> to vector<16x32xf32>
    %15 = arith.subf %0, %14 : vector<16x32xf32>
    %cst_8 = arith.constant 9.99999974E-6 : f32
    %16 = vector.broadcast %cst_8 : f32 to vector<16x1xf32>
    %17 = arith.addf %13, %16 : vector<16x1xf32>
    %18 = math.rsqrt %17 : vector<16x1xf32>
    %19 = vector.broadcast %18 : vector<16x1xf32> to vector<16x32xf32>
    %20 = arith.mulf %15, %19 : vector<16x32xf32>
    %21 = vector.broadcast %1 : vector<1x32xf32> to vector<16x32xf32>
    %22 = arith.mulf %20, %21 : vector<16x32xf32>
    %23 = vector.broadcast %2 : vector<1x32xf32> to vector<16x32xf32>
    %24 = arith.addf %22, %23 : vector<16x32xf32>
    %c0_9 = arith.constant 0 : index
    %c0_10 = arith.constant 0 : index
    %25 = vector.load %arg1[%c0_9, %c0_10] : memref<2x8xf32, #tpu.memory_space<vmem>>, vector<2x8xf32>
    %cst_11 = arith.constant 1.000000e+00 : f32
    %26 = vector.broadcast %cst_11 : f32 to vector<2x8xf32>
    %27 = arith.subf %26, %25 : vector<2x8xf32>
    %cst_12 = arith.constant -1.000000e+09 : f32
    %28 = vector.broadcast %cst_12 : f32 to vector<2x8xf32>
    %29 = arith.mulf %27, %28 : vector<2x8xf32>
    %30 = vector.shape_cast %29 : vector<2x8xf32> to vector<2x1x8xf32>
    %31 = arith.truncf %24 : vector<16x32xf32> to vector<16x32xbf16>
    %c0_13 = arith.constant 0 : index
    %c0_14 = arith.constant 0 : index
    %c0_15 = arith.constant 0 : index
    %32 = vector.load %arg5[%c0_13, %c0_14, %c0_15] : memref<2x32x96xbf16, #tpu.memory_space<vmem>>, vector<1x32x96xbf16>
    %33 = vector.shape_cast %32 : vector<1x32x96xbf16> to vector<32x96xbf16>
    %cst_16 = arith.constant dense<0.000000e+00> : vector<16x96xf32>
    %34 = tpu.matmul %31, %33, %cst_16 {dimension_numbers = #tpu.dot_dimension_numbers<[1], [0], [0], [1], [0, 0, 1, 1], [], []>} : vector<16x32xbf16>, vector<32x96xbf16>, vector<16x96xf32> -> vector<16x96xf32>
    %c0_17 = arith.constant 0 : index
    %c0_18 = arith.constant 0 : index
    %c0_19 = arith.constant 0 : index
    %35 = vector.load %arg6[%c0_17, %c0_18, %c0_19] : memref<2x1x96xf32, #tpu.memory_space<vmem>>, vector<1x1x96xf32>
    %36 = vector.shape_cast %35 : vector<1x1x96xf32> to vector<1x96xf32>
    %37 = vector.broadcast %36 : vector<1x96xf32> to vector<16x96xf32>
    %38 = arith.addf %34, %37 : vector<16x96xf32>
    %cst_20 = arith.constant 0.000000e+00 : f32
    %39 = vector.broadcast %cst_20 : f32 to vector<16x32xf32>
    %40 = vector.extract_strided_slice %38 {offsets = [0, 0], sizes = [16, 8], strides = [1, 1]} : vector<16x96xf32> to vector<16x8xf32>
    %41 = vector.shape_cast %40 : vector<16x8xf32> to vector<2x8x8xf32>
    %42 = arith.truncf %41 : vector<2x8x8xf32> to vector<2x8x8xbf16>
    %43 = vector.extract_strided_slice %38 {offsets = [0, 32], sizes = [16, 8], strides = [1, 1]} : vector<16x96xf32> to vector<16x8xf32>
    %44 = vector.shape_cast %43 : vector<16x8xf32> to vector<2x8x8xf32>
    %45 = arith.truncf %44 : vector<2x8x8xf32> to vector<2x8x8xbf16>
    %46 = vector.extract_strided_slice %38 {offsets = [0, 64], sizes = [16, 8], strides = [1, 1]} : vector<16x96xf32> to vector<16x8xf32>
    %47 = vector.shape_cast %46 : vector<16x8xf32> to vector<2x8x8xf32>
    %48 = arith.truncf %47 : vector<2x8x8xf32> to vector<2x8x8xbf16>
    "tpu.trace_start"() <{level = 10 : i32, message = "bqd,bkd->bqk"}> : () -> ()
    %cst_21 = arith.constant dense<0.000000e+00> : vector<2x8x8xf32>
    %49 = tpu.matmul %42, %45, %cst_21 {dimension_numbers = #tpu.dot_dimension_numbers<[2], [2], [1], [1], [0, 0, 0, 1, 1, 1], [0], [0]>} : vector<2x8x8xbf16>, vector<2x8x8xbf16>, vector<2x8x8xf32> -> vector<2x8x8xf32>
    "tpu.trace_stop"() : () -> ()
    %50 = vector.broadcast %30 : vector<2x1x8xf32> to vector<2x8x8xf32>
    %51 = arith.addf %49, %50 : vector<2x8x8xf32>
    %cst_22 = arith.constant dense<0xFF800000> : vector<2x8xf32>
    %52 = vector.multi_reduction <maximumf>, %51, %cst_22 [2] : vector<2x8x8xf32> to vector<2x8xf32>
    %53 = vector.shape_cast %52 : vector<2x8xf32> to vector<2x8x1xf32>
    %54 = vector.broadcast %53 : vector<2x8x1xf32> to vector<2x8x8xf32>
    %55 = arith.subf %51, %54 : vector<2x8x8xf32>
    %56 = math.exp %55 : vector<2x8x8xf32>
    %cst_23 = arith.constant dense<0.000000e+00> : vector<2x8xf32>
    %57 = vector.multi_reduction <add>, %56, %cst_23 [2] : vector<2x8x8xf32> to vector<2x8xf32>
    %58 = vector.shape_cast %57 : vector<2x8xf32> to vector<2x8x1xf32>
    %59 = tpu.reciprocal %58 {approx = true} : vector<2x8x1xf32> -> vector<2x8x1xf32>
    %60 = vector.broadcast %59 : vector<2x8x1xf32> to vector<2x8x8xf32>
    %61 = arith.mulf %56, %60 : vector<2x8x8xf32>
    %62 = arith.truncf %61 : vector<2x8x8xf32> to vector<2x8x8xbf16>
    "tpu.trace_start"() <{level = 10 : i32, message = "bqk,bkd->bqd"}> : () -> ()
    %cst_24 = arith.constant dense<0.000000e+00> : vector<2x8x8xf32>
    %63 = tpu.matmul %62, %48, %cst_24 {dimension_numbers = #tpu.dot_dimension_numbers<[2], [1], [1], [2], [0, 0, 0, 1, 1, 2], [0], [0]>} : vector<2x8x8xbf16>, vector<2x8x8xbf16>, vector<2x8x8xf32> -> vector<2x8x8xf32>
    "tpu.trace_stop"() : () -> ()
    %64 = vector.shape_cast %63 : vector<2x8x8xf32> to vector<16x8xf32>
    %65 = arith.truncf %64 : vector<16x8xf32> to vector<16x8xbf16>
    %c0_25 = arith.constant 0 : index
    %c0_26 = arith.constant 0 : index
    %c0_27 = arith.constant 0 : index
    %66 = vector.load %arg7[%c0_25, %c0_26, %c0_27] : memref<8x8x32xbf16, #tpu.memory_space<vmem>>, vector<1x8x32xbf16>
    %67 = vector.shape_cast %66 : vector<1x8x32xbf16> to vector<8x32xbf16>
    %cst_28 = arith.constant dense<0.000000e+00> : vector<16x32xf32>
    %68 = tpu.matmul %65, %67, %cst_28 {dimension_numbers = #tpu.dot_dimension_numbers<[1], [0], [0], [1], [0, 0, 1, 1], [], []>} : vector<16x8xbf16>, vector<8x32xbf16>, vector<16x32xf32> -> vector<16x32xf32>
    %69 = arith.addf %39, %68 : vector<16x32xf32>
    %70 = vector.extract_strided_slice %38 {offsets = [0, 8], sizes = [16, 8], strides = [1, 1]} : vector<16x96xf32> to vector<16x8xf32>
    %71 = vector.shape_cast %70 : vector<16x8xf32> to vector<2x8x8xf32>
    %72 = arith.truncf %71 : vector<2x8x8xf32> to vector<2x8x8xbf16>
    %73 = vector.extract_strided_slice %38 {offsets = [0, 40], sizes = [16, 8], strides = [1, 1]} : vector<16x96xf32> to vector<16x8xf32>
    %74 = vector.shape_cast %73 : vector<16x8xf32> to vector<2x8x8xf32>
    %75 = arith.truncf %74 : vector<2x8x8xf32> to vector<2x8x8xbf16>
    %76 = vector.extract_strided_slice %38 {offsets = [0, 72], sizes = [16, 8], strides = [1, 1]} : vector<16x96xf32> to vector<16x8xf32>
    %77 = vector.shape_cast %76 : vector<16x8xf32> to vector<2x8x8xf32>
    %78 = arith.truncf %77 : vector<2x8x8xf32> to vector<2x8x8xbf16>
    "tpu.trace_start"() <{level = 10 : i32, message = "bqd,bkd->bqk"}> : () -> ()
    %cst_29 = arith.constant dense<0.000000e+00> : vector<2x8x8xf32>
    %79 = tpu.matmul %72, %75, %cst_29 {dimension_numbers = #tpu.dot_dimension_numbers<[2], [2], [1], [1], [0, 0, 0, 1, 1, 1], [0], [0]>} : vector<2x8x8xbf16>, vector<2x8x8xbf16>, vector<2x8x8xf32> -> vector<2x8x8xf32>
    "tpu.trace_stop"() : () -> ()
    %80 = vector.broadcast %30 : vector<2x1x8xf32> to vector<2x8x8xf32>
    %81 = arith.addf %79, %80 : vector<2x8x8xf32>
    %cst_30 = arith.constant dense<0xFF800000> : vector<2x8xf32>
    %82 = vector.multi_reduction <maximumf>, %81, %cst_30 [2] : vector<2x8x8xf32> to vector<2x8xf32>
    %83 = vector.shape_cast %82 : vector<2x8xf32> to vector<2x8x1xf32>
    %84 = vector.broadcast %83 : vector<2x8x1xf32> to vector<2x8x8xf32>
    %85 = arith.subf %81, %84 : vector<2x8x8xf32>
    %86 = math.exp %85 : vector<2x8x8xf32>
    %cst_31 = arith.constant dense<0.000000e+00> : vector<2x8xf32>
    %87 = vector.multi_reduction <add>, %86, %cst_31 [2] : vector<2x8x8xf32> to vector<2x8xf32>
    %88 = vector.shape_cast %87 : vector<2x8xf32> to vector<2x8x1xf32>
    %89 = tpu.reciprocal %88 {approx = true} : vector<2x8x1xf32> -> vector<2x8x1xf32>
    %90 = vector.broadcast %89 : vector<2x8x1xf32> to vector<2x8x8xf32>
    %91 = arith.mulf %86, %90 : vector<2x8x8xf32>
    %92 = arith.truncf %91 : vector<2x8x8xf32> to vector<2x8x8xbf16>
    "tpu.trace_start"() <{level = 10 : i32, message = "bqk,bkd->bqd"}> : () -> ()
    %cst_32 = arith.constant dense<0.000000e+00> : vector<2x8x8xf32>
    %93 = tpu.matmul %92, %78, %cst_32 {dimension_numbers = #tpu.dot_dimension_numbers<[2], [1], [1], [2], [0, 0, 0, 1, 1, 2], [0], [0]>} : vector<2x8x8xbf16>, vector<2x8x8xbf16>, vector<2x8x8xf32> -> vector<2x8x8xf32>
    "tpu.trace_stop"() : () -> ()
    %94 = vector.shape_cast %93 : vector<2x8x8xf32> to vector<16x8xf32>
    %95 = arith.truncf %94 : vector<16x8xf32> to vector<16x8xbf16>
    %c1 = arith.constant 1 : index
    %c0_33 = arith.constant 0 : index
    %c0_34 = arith.constant 0 : index
    %96 = vector.load %arg7[%c1, %c0_33, %c0_34] : memref<8x8x32xbf16, #tpu.memory_space<vmem>>, vector<1x8x32xbf16>
    %97 = vector.shape_cast %96 : vector<1x8x32xbf16> to vector<8x32xbf16>
    %cst_35 = arith.constant dense<0.000000e+00> : vector<16x32xf32>
    %98 = tpu.matmul %95, %97, %cst_35 {dimension_numbers = #tpu.dot_dimension_numbers<[1], [0], [0], [1], [0, 0, 1, 1], [], []>} : vector<16x8xbf16>, vector<8x32xbf16>, vector<16x32xf32> -> vector<16x32xf32>
    %99 = arith.addf %69, %98 : vector<16x32xf32>
    %100 = vector.extract_strided_slice %38 {offsets = [0, 16], sizes = [16, 8], strides = [1, 1]} : vector<16x96xf32> to vector<16x8xf32>
    %101 = vector.shape_cast %100 : vector<16x8xf32> to vector<2x8x8xf32>
    %102 = arith.truncf %101 : vector<2x8x8xf32> to vector<2x8x8xbf16>
    %103 = vector.extract_strided_slice %38 {offsets = [0, 48], sizes = [16, 8], strides = [1, 1]} : vector<16x96xf32> to vector<16x8xf32>
    %104 = vector.shape_cast %103 : vector<16x8xf32> to vector<2x8x8xf32>
    %105 = arith.truncf %104 : vector<2x8x8xf32> to vector<2x8x8xbf16>
    %106 = vector.extract_strided_slice %38 {offsets = [0, 80], sizes = [16, 8], strides = [1, 1]} : vector<16x96xf32> to vector<16x8xf32>
    %107 = vector.shape_cast %106 : vector<16x8xf32> to vector<2x8x8xf32>
    %108 = arith.truncf %107 : vector<2x8x8xf32> to vector<2x8x8xbf16>
    "tpu.trace_start"() <{level = 10 : i32, message = "bqd,bkd->bqk"}> : () -> ()
    %cst_36 = arith.constant dense<0.000000e+00> : vector<2x8x8xf32>
    %109 = tpu.matmul %102, %105, %cst_36 {dimension_numbers = #tpu.dot_dimension_numbers<[2], [2], [1], [1], [0, 0, 0, 1, 1, 1], [0], [0]>} : vector<2x8x8xbf16>, vector<2x8x8xbf16>, vector<2x8x8xf32> -> vector<2x8x8xf32>
    "tpu.trace_stop"() : () -> ()
    %110 = vector.broadcast %30 : vector<2x1x8xf32> to vector<2x8x8xf32>
    %111 = arith.addf %109, %110 : vector<2x8x8xf32>
    %cst_37 = arith.constant dense<0xFF800000> : vector<2x8xf32>
    %112 = vector.multi_reduction <maximumf>, %111, %cst_37 [2] : vector<2x8x8xf32> to vector<2x8xf32>
    %113 = vector.shape_cast %112 : vector<2x8xf32> to vector<2x8x1xf32>
    %114 = vector.broadcast %113 : vector<2x8x1xf32> to vector<2x8x8xf32>
    %115 = arith.subf %111, %114 : vector<2x8x8xf32>
    %116 = math.exp %115 : vector<2x8x8xf32>
    %cst_38 = arith.constant dense<0.000000e+00> : vector<2x8xf32>
    %117 = vector.multi_reduction <add>, %116, %cst_38 [2] : vector<2x8x8xf32> to vector<2x8xf32>
    %118 = vector.shape_cast %117 : vector<2x8xf32> to vector<2x8x1xf32>
    %119 = tpu.reciprocal %118 {approx = true} : vector<2x8x1xf32> -> vector<2x8x1xf32>
    %120 = vector.broadcast %119 : vector<2x8x1xf32> to vector<2x8x8xf32>
    %121 = arith.mulf %116, %120 : vector<2x8x8xf32>
    %122 = arith.truncf %121 : vector<2x8x8xf32> to vector<2x8x8xbf16>
    "tpu.trace_start"() <{level = 10 : i32, message = "bqk,bkd->bqd"}> : () -> ()
    %cst_39 = arith.constant dense<0.000000e+00> : vector<2x8x8xf32>
    %123 = tpu.matmul %122, %108, %cst_39 {dimension_numbers = #tpu.dot_dimension_numbers<[2], [1], [1], [2], [0, 0, 0, 1, 1, 2], [0], [0]>} : vector<2x8x8xbf16>, vector<2x8x8xbf16>, vector<2x8x8xf32> -> vector<2x8x8xf32>
    "tpu.trace_stop"() : () -> ()
    %124 = vector.shape_cast %123 : vector<2x8x8xf32> to vector<16x8xf32>
    %125 = arith.truncf %124 : vector<16x8xf32> to vector<16x8xbf16>
    %c2 = arith.constant 2 : index
    %c0_40 = arith.constant 0 : index
    %c0_41 = arith.constant 0 : index
    %126 = vector.load %arg7[%c2, %c0_40, %c0_41] : memref<8x8x32xbf16, #tpu.memory_space<vmem>>, vector<1x8x32xbf16>
    %127 = vector.shape_cast %126 : vector<1x8x32xbf16> to vector<8x32xbf16>
    %cst_42 = arith.constant dense<0.000000e+00> : vector<16x32xf32>
    %128 = tpu.matmul %125, %127, %cst_42 {dimension_numbers = #tpu.dot_dimension_numbers<[1], [0], [0], [1], [0, 0, 1, 1], [], []>} : vector<16x8xbf16>, vector<8x32xbf16>, vector<16x32xf32> -> vector<16x32xf32>
    %129 = arith.addf %99, %128 : vector<16x32xf32>
    %130 = vector.extract_strided_slice %38 {offsets = [0, 24], sizes = [16, 8], strides = [1, 1]} : vector<16x96xf32> to vector<16x8xf32>
    %131 = vector.shape_cast %130 : vector<16x8xf32> to vector<2x8x8xf32>
    %132 = arith.truncf %131 : vector<2x8x8xf32> to vector<2x8x8xbf16>
    %133 = vector.extract_strided_slice %38 {offsets = [0, 56], sizes = [16, 8], strides = [1, 1]} : vector<16x96xf32> to vector<16x8xf32>
    %134 = vector.shape_cast %133 : vector<16x8xf32> to vector<2x8x8xf32>
    %135 = arith.truncf %134 : vector<2x8x8xf32> to vector<2x8x8xbf16>
    %136 = vector.extract_strided_slice %38 {offsets = [0, 88], sizes = [16, 8], strides = [1, 1]} : vector<16x96xf32> to vector<16x8xf32>
    %137 = vector.shape_cast %136 : vector<16x8xf32> to vector<2x8x8xf32>
    %138 = arith.truncf %137 : vector<2x8x8xf32> to vector<2x8x8xbf16>
    "tpu.trace_start"() <{level = 10 : i32, message = "bqd,bkd->bqk"}> : () -> ()
    %cst_43 = arith.constant dense<0.000000e+00> : vector<2x8x8xf32>
    %139 = tpu.matmul %132, %135, %cst_43 {dimension_numbers = #tpu.dot_dimension_numbers<[2], [2], [1], [1], [0, 0, 0, 1, 1, 1], [0], [0]>} : vector<2x8x8xbf16>, vector<2x8x8xbf16>, vector<2x8x8xf32> -> vector<2x8x8xf32>
    "tpu.trace_stop"() : () -> ()
    %140 = vector.broadcast %30 : vector<2x1x8xf32> to vector<2x8x8xf32>
    %141 = arith.addf %139, %140 : vector<2x8x8xf32>
    %cst_44 = arith.constant dense<0xFF800000> : vector<2x8xf32>
    %142 = vector.multi_reduction <maximumf>, %141, %cst_44 [2] : vector<2x8x8xf32> to vector<2x8xf32>
    %143 = vector.shape_cast %142 : vector<2x8xf32> to vector<2x8x1xf32>
    %144 = vector.broadcast %143 : vector<2x8x1xf32> to vector<2x8x8xf32>
    %145 = arith.subf %141, %144 : vector<2x8x8xf32>
    %146 = math.exp %145 : vector<2x8x8xf32>
    %cst_45 = arith.constant dense<0.000000e+00> : vector<2x8xf32>
    %147 = vector.multi_reduction <add>, %146, %cst_45 [2] : vector<2x8x8xf32> to vector<2x8xf32>
    %148 = vector.shape_cast %147 : vector<2x8xf32> to vector<2x8x1xf32>
    %149 = tpu.reciprocal %148 {approx = true} : vector<2x8x1xf32> -> vector<2x8x1xf32>
    %150 = vector.broadcast %149 : vector<2x8x1xf32> to vector<2x8x8xf32>
    %151 = arith.mulf %146, %150 : vector<2x8x8xf32>
    %152 = arith.truncf %151 : vector<2x8x8xf32> to vector<2x8x8xbf16>
    "tpu.trace_start"() <{level = 10 : i32, message = "bqk,bkd->bqd"}> : () -> ()
    %cst_46 = arith.constant dense<0.000000e+00> : vector<2x8x8xf32>
    %153 = tpu.matmul %152, %138, %cst_46 {dimension_numbers = #tpu.dot_dimension_numbers<[2], [1], [1], [2], [0, 0, 0, 1, 1, 2], [0], [0]>} : vector<2x8x8xbf16>, vector<2x8x8xbf16>, vector<2x8x8xf32> -> vector<2x8x8xf32>
    "tpu.trace_stop"() : () -> ()
    %154 = vector.shape_cast %153 : vector<2x8x8xf32> to vector<16x8xf32>
    %155 = arith.truncf %154 : vector<16x8xf32> to vector<16x8xbf16>
    %c3 = arith.constant 3 : index
    %c0_47 = arith.constant 0 : index
    %c0_48 = arith.constant 0 : index
    %156 = vector.load %arg7[%c3, %c0_47, %c0_48] : memref<8x8x32xbf16, #tpu.memory_space<vmem>>, vector<1x8x32xbf16>
    %157 = vector.shape_cast %156 : vector<1x8x32xbf16> to vector<8x32xbf16>
    %cst_49 = arith.constant dense<0.000000e+00> : vector<16x32xf32>
    %158 = tpu.matmul %155, %157, %cst_49 {dimension_numbers = #tpu.dot_dimension_numbers<[1], [0], [0], [1], [0, 0, 1, 1], [], []>} : vector<16x8xbf16>, vector<8x32xbf16>, vector<16x32xf32> -> vector<16x32xf32>
    %159 = arith.addf %129, %158 : vector<16x32xf32>
    %c0_50 = arith.constant 0 : index
    %c0_51 = arith.constant 0 : index
    %c0_52 = arith.constant 0 : index
    %160 = vector.load %arg8[%c0_50, %c0_51, %c0_52] : memref<2x1x32xf32, #tpu.memory_space<vmem>>, vector<1x1x32xf32>
    %161 = vector.shape_cast %160 : vector<1x1x32xf32> to vector<1x32xf32>
    %162 = vector.broadcast %161 : vector<1x32xf32> to vector<16x32xf32>
    %163 = arith.addf %159, %162 : vector<16x32xf32>
    %164 = arith.addf %163, %24 : vector<16x32xf32>
    %c0_53 = arith.constant 0 : index
    %c0_54 = arith.constant 0 : index
    %c0_55 = arith.constant 0 : index
    %165 = vector.load %arg9[%c0_53, %c0_54, %c0_55] : memref<2x1x32xf32, #tpu.memory_space<vmem>>, vector<1x1x32xf32>
    %166 = vector.shape_cast %165 : vector<1x1x32xf32> to vector<1x32xf32>
    %c0_56 = arith.constant 0 : index
    %c0_57 = arith.constant 0 : index
    %c0_58 = arith.constant 0 : index
    %167 = vector.load %arg10[%c0_56, %c0_57, %c0_58] : memref<2x1x32xf32, #tpu.memory_space<vmem>>, vector<1x1x32xf32>
    %168 = vector.shape_cast %167 : vector<1x1x32xf32> to vector<1x32xf32>
    %cst_59 = arith.constant dense<0.000000e+00> : vector<16xf32>
    %169 = vector.multi_reduction <add>, %164, %cst_59 [1] : vector<16x32xf32> to vector<16xf32>
    %170 = vector.shape_cast %169 : vector<16xf32> to vector<16x1xf32>
    %cst_60 = arith.constant 3.200000e+01 : f32
    %171 = vector.broadcast %cst_60 : f32 to vector<16x1xf32>
    %172 = arith.divf %170, %171 : vector<16x1xf32>
    %173 = vector.broadcast %172 : vector<16x1xf32> to vector<16x32xf32>
    %174 = arith.subf %164, %173 : vector<16x32xf32>
    %175 = arith.mulf %174, %174 : vector<16x32xf32>
    %cst_61 = arith.constant dense<0.000000e+00> : vector<16xf32>
    %176 = vector.multi_reduction <add>, %175, %cst_61 [1] : vector<16x32xf32> to vector<16xf32>
    %177 = vector.shape_cast %176 : vector<16xf32> to vector<16x1xf32>
    %cst_62 = arith.constant 3.200000e+01 : f32
    %178 = vector.broadcast %cst_62 : f32 to vector<16x1xf32>
    %179 = arith.divf %177, %178 : vector<16x1xf32>
    %180 = vector.broadcast %172 : vector<16x1xf32> to vector<16x32xf32>
    %181 = arith.subf %164, %180 : vector<16x32xf32>
    %cst_63 = arith.constant 9.99999974E-6 : f32
    %182 = vector.broadcast %cst_63 : f32 to vector<16x1xf32>
    %183 = arith.addf %179, %182 : vector<16x1xf32>
    %184 = math.rsqrt %183 : vector<16x1xf32>
    %185 = vector.broadcast %184 : vector<16x1xf32> to vector<16x32xf32>
    %186 = arith.mulf %181, %185 : vector<16x32xf32>
    %187 = vector.broadcast %166 : vector<1x32xf32> to vector<16x32xf32>
    %188 = arith.mulf %186, %187 : vector<16x32xf32>
    %189 = vector.broadcast %168 : vector<1x32xf32> to vector<16x32xf32>
    %190 = arith.addf %188, %189 : vector<16x32xf32>
    %191 = arith.truncf %190 : vector<16x32xf32> to vector<16x32xbf16>
    %c0_64 = arith.constant 0 : index
    %c0_65 = arith.constant 0 : index
    %c0_66 = arith.constant 0 : index
    %192 = vector.load %arg11[%c0_64, %c0_65, %c0_66] : memref<2x32x64xbf16, #tpu.memory_space<vmem>>, vector<1x32x64xbf16>
    %193 = vector.shape_cast %192 : vector<1x32x64xbf16> to vector<32x64xbf16>
    %cst_67 = arith.constant dense<0.000000e+00> : vector<16x64xf32>
    %194 = tpu.matmul %191, %193, %cst_67 {dimension_numbers = #tpu.dot_dimension_numbers<[1], [0], [0], [1], [0, 0, 1, 1], [], []>} : vector<16x32xbf16>, vector<32x64xbf16>, vector<16x64xf32> -> vector<16x64xf32>
    %c0_68 = arith.constant 0 : index
    %c0_69 = arith.constant 0 : index
    %c0_70 = arith.constant 0 : index
    %195 = vector.load %arg12[%c0_68, %c0_69, %c0_70] : memref<2x1x64xf32, #tpu.memory_space<vmem>>, vector<1x1x64xf32>
    %196 = vector.shape_cast %195 : vector<1x1x64xf32> to vector<1x64xf32>
    %197 = vector.broadcast %196 : vector<1x64xf32> to vector<16x64xf32>
    %198 = arith.addf %194, %197 : vector<16x64xf32>
    %199 = arith.mulf %198, %198 : vector<16x64xf32>
    %200 = arith.mulf %198, %199 : vector<16x64xf32>
    %cst_71 = arith.constant 4.471500e-02 : f32
    %201 = vector.broadcast %cst_71 : f32 to vector<16x64xf32>
    %202 = arith.mulf %201, %200 : vector<16x64xf32>
    %203 = arith.addf %198, %202 : vector<16x64xf32>
    %cst_72 = arith.constant 0.797884583 : f32
    %204 = vector.broadcast %cst_72 : f32 to vector<16x64xf32>
    %205 = arith.mulf %204, %203 : vector<16x64xf32>
    %206 = math.tanh %205 : vector<16x64xf32>
    %cst_73 = arith.constant 1.000000e+00 : f32
    %207 = vector.broadcast %cst_73 : f32 to vector<16x64xf32>
    %208 = arith.addf %207, %206 : vector<16x64xf32>
    %cst_74 = arith.constant 5.000000e-01 : f32
    %209 = vector.broadcast %cst_74 : f32 to vector<16x64xf32>
    %210 = arith.mulf %209, %208 : vector<16x64xf32>
    %211 = arith.mulf %198, %210 : vector<16x64xf32>
    %212 = arith.truncf %211 : vector<16x64xf32> to vector<16x64xbf16>
    %c0_75 = arith.constant 0 : index
    %c0_76 = arith.constant 0 : index
    %c0_77 = arith.constant 0 : index
    %213 = vector.load %arg13[%c0_75, %c0_76, %c0_77] : memref<2x64x32xbf16, #tpu.memory_space<vmem>>, vector<1x64x32xbf16>
    %214 = vector.shape_cast %213 : vector<1x64x32xbf16> to vector<64x32xbf16>
    %cst_78 = arith.constant dense<0.000000e+00> : vector<16x32xf32>
    %215 = tpu.matmul %212, %214, %cst_78 {dimension_numbers = #tpu.dot_dimension_numbers<[1], [0], [0], [1], [0, 0, 1, 1], [], []>} : vector<16x64xbf16>, vector<64x32xbf16>, vector<16x32xf32> -> vector<16x32xf32>
    %c0_79 = arith.constant 0 : index
    %c0_80 = arith.constant 0 : index
    %c0_81 = arith.constant 0 : index
    %216 = vector.load %arg14[%c0_79, %c0_80, %c0_81] : memref<2x1x32xf32, #tpu.memory_space<vmem>>, vector<1x1x32xf32>
    %217 = vector.shape_cast %216 : vector<1x1x32xf32> to vector<1x32xf32>
    %218 = vector.broadcast %217 : vector<1x32xf32> to vector<16x32xf32>
    %219 = arith.addf %215, %218 : vector<16x32xf32>
    %220 = arith.addf %219, %190 : vector<16x32xf32>
    %c0_82 = arith.constant 0 : index
    %c0_83 = arith.constant 0 : index
    %c0_84 = arith.constant 0 : index
    %221 = vector.load %arg15[%c0_82, %c0_83, %c0_84] : memref<2x1x32xf32, #tpu.memory_space<vmem>>, vector<1x1x32xf32>
    %222 = vector.shape_cast %221 : vector<1x1x32xf32> to vector<1x32xf32>
    %c0_85 = arith.constant 0 : index
    %c0_86 = arith.constant 0 : index
    %c0_87 = arith.constant 0 : index
    %223 = vector.load %arg16[%c0_85, %c0_86, %c0_87] : memref<2x1x32xf32, #tpu.memory_space<vmem>>, vector<1x1x32xf32>
    %224 = vector.shape_cast %223 : vector<1x1x32xf32> to vector<1x32xf32>
    %cst_88 = arith.constant dense<0.000000e+00> : vector<16xf32>
    %225 = vector.multi_reduction <add>, %220, %cst_88 [1] : vector<16x32xf32> to vector<16xf32>
    %226 = vector.shape_cast %225 : vector<16xf32> to vector<16x1xf32>
    %cst_89 = arith.constant 3.200000e+01 : f32
    %227 = vector.broadcast %cst_89 : f32 to vector<16x1xf32>
    %228 = arith.divf %226, %227 : vector<16x1xf32>
    %229 = vector.broadcast %228 : vector<16x1xf32> to vector<16x32xf32>
    %230 = arith.subf %220, %229 : vector<16x32xf32>
    %231 = arith.mulf %230, %230 : vector<16x32xf32>
    %cst_90 = arith.constant dense<0.000000e+00> : vector<16xf32>
    %232 = vector.multi_reduction <add>, %231, %cst_90 [1] : vector<16x32xf32> to vector<16xf32>
    %233 = vector.shape_cast %232 : vector<16xf32> to vector<16x1xf32>
    %cst_91 = arith.constant 3.200000e+01 : f32
    %234 = vector.broadcast %cst_91 : f32 to vector<16x1xf32>
    %235 = arith.divf %233, %234 : vector<16x1xf32>
    %236 = vector.broadcast %228 : vector<16x1xf32> to vector<16x32xf32>
    %237 = arith.subf %220, %236 : vector<16x32xf32>
    %cst_92 = arith.constant 9.99999974E-6 : f32
    %238 = vector.broadcast %cst_92 : f32 to vector<16x1xf32>
    %239 = arith.addf %235, %238 : vector<16x1xf32>
    %240 = math.rsqrt %239 : vector<16x1xf32>
    %241 = vector.broadcast %240 : vector<16x1xf32> to vector<16x32xf32>
    %242 = arith.mulf %237, %241 : vector<16x32xf32>
    %243 = vector.broadcast %222 : vector<1x32xf32> to vector<16x32xf32>
    %244 = arith.mulf %242, %243 : vector<16x32xf32>
    %245 = vector.broadcast %224 : vector<1x32xf32> to vector<16x32xf32>
    %246 = arith.addf %244, %245 : vector<16x32xf32>
    %247 = arith.truncf %246 : vector<16x32xf32> to vector<16x32xbf16>
    %c1_93 = arith.constant 1 : index
    %c0_94 = arith.constant 0 : index
    %c0_95 = arith.constant 0 : index
    %248 = vector.load %arg5[%c1_93, %c0_94, %c0_95] : memref<2x32x96xbf16, #tpu.memory_space<vmem>>, vector<1x32x96xbf16>
    %249 = vector.shape_cast %248 : vector<1x32x96xbf16> to vector<32x96xbf16>
    %cst_96 = arith.constant dense<0.000000e+00> : vector<16x96xf32>
    %250 = tpu.matmul %247, %249, %cst_96 {dimension_numbers = #tpu.dot_dimension_numbers<[1], [0], [0], [1], [0, 0, 1, 1], [], []>} : vector<16x32xbf16>, vector<32x96xbf16>, vector<16x96xf32> -> vector<16x96xf32>
    %c1_97 = arith.constant 1 : index
    %c0_98 = arith.constant 0 : index
    %c0_99 = arith.constant 0 : index
    %251 = vector.load %arg6[%c1_97, %c0_98, %c0_99] : memref<2x1x96xf32, #tpu.memory_space<vmem>>, vector<1x1x96xf32>
    %252 = vector.shape_cast %251 : vector<1x1x96xf32> to vector<1x96xf32>
    %253 = vector.broadcast %252 : vector<1x96xf32> to vector<16x96xf32>
    %254 = arith.addf %250, %253 : vector<16x96xf32>
    %cst_100 = arith.constant 0.000000e+00 : f32
    %255 = vector.broadcast %cst_100 : f32 to vector<16x32xf32>
    %256 = vector.extract_strided_slice %254 {offsets = [0, 0], sizes = [16, 8], strides = [1, 1]} : vector<16x96xf32> to vector<16x8xf32>
    %257 = vector.shape_cast %256 : vector<16x8xf32> to vector<2x8x8xf32>
    %258 = arith.truncf %257 : vector<2x8x8xf32> to vector<2x8x8xbf16>
    %259 = vector.extract_strided_slice %254 {offsets = [0, 32], sizes = [16, 8], strides = [1, 1]} : vector<16x96xf32> to vector<16x8xf32>
    %260 = vector.shape_cast %259 : vector<16x8xf32> to vector<2x8x8xf32>
    %261 = arith.truncf %260 : vector<2x8x8xf32> to vector<2x8x8xbf16>
    %262 = vector.extract_strided_slice %254 {offsets = [0, 64], sizes = [16, 8], strides = [1, 1]} : vector<16x96xf32> to vector<16x8xf32>
    %263 = vector.shape_cast %262 : vector<16x8xf32> to vector<2x8x8xf32>
    %264 = arith.truncf %263 : vector<2x8x8xf32> to vector<2x8x8xbf16>
    "tpu.trace_start"() <{level = 10 : i32, message = "bqd,bkd->bqk"}> : () -> ()
    %cst_101 = arith.constant dense<0.000000e+00> : vector<2x8x8xf32>
    %265 = tpu.matmul %258, %261, %cst_101 {dimension_numbers = #tpu.dot_dimension_numbers<[2], [2], [1], [1], [0, 0, 0, 1, 1, 1], [0], [0]>} : vector<2x8x8xbf16>, vector<2x8x8xbf16>, vector<2x8x8xf32> -> vector<2x8x8xf32>
    "tpu.trace_stop"() : () -> ()
    %266 = vector.broadcast %30 : vector<2x1x8xf32> to vector<2x8x8xf32>
    %267 = arith.addf %265, %266 : vector<2x8x8xf32>
    %cst_102 = arith.constant dense<0xFF800000> : vector<2x8xf32>
    %268 = vector.multi_reduction <maximumf>, %267, %cst_102 [2] : vector<2x8x8xf32> to vector<2x8xf32>
    %269 = vector.shape_cast %268 : vector<2x8xf32> to vector<2x8x1xf32>
    %270 = vector.broadcast %269 : vector<2x8x1xf32> to vector<2x8x8xf32>
    %271 = arith.subf %267, %270 : vector<2x8x8xf32>
    %272 = math.exp %271 : vector<2x8x8xf32>
    %cst_103 = arith.constant dense<0.000000e+00> : vector<2x8xf32>
    %273 = vector.multi_reduction <add>, %272, %cst_103 [2] : vector<2x8x8xf32> to vector<2x8xf32>
    %274 = vector.shape_cast %273 : vector<2x8xf32> to vector<2x8x1xf32>
    %275 = tpu.reciprocal %274 {approx = true} : vector<2x8x1xf32> -> vector<2x8x1xf32>
    %276 = vector.broadcast %275 : vector<2x8x1xf32> to vector<2x8x8xf32>
    %277 = arith.mulf %272, %276 : vector<2x8x8xf32>
    %278 = arith.truncf %277 : vector<2x8x8xf32> to vector<2x8x8xbf16>
    "tpu.trace_start"() <{level = 10 : i32, message = "bqk,bkd->bqd"}> : () -> ()
    %cst_104 = arith.constant dense<0.000000e+00> : vector<2x8x8xf32>
    %279 = tpu.matmul %278, %264, %cst_104 {dimension_numbers = #tpu.dot_dimension_numbers<[2], [1], [1], [2], [0, 0, 0, 1, 1, 2], [0], [0]>} : vector<2x8x8xbf16>, vector<2x8x8xbf16>, vector<2x8x8xf32> -> vector<2x8x8xf32>
    "tpu.trace_stop"() : () -> ()
    %280 = vector.shape_cast %279 : vector<2x8x8xf32> to vector<16x8xf32>
    %281 = arith.truncf %280 : vector<16x8xf32> to vector<16x8xbf16>
    %c4 = arith.constant 4 : index
    %c0_105 = arith.constant 0 : index
    %c0_106 = arith.constant 0 : index
    %282 = vector.load %arg7[%c4, %c0_105, %c0_106] : memref<8x8x32xbf16, #tpu.memory_space<vmem>>, vector<1x8x32xbf16>
    %283 = vector.shape_cast %282 : vector<1x8x32xbf16> to vector<8x32xbf16>
    %cst_107 = arith.constant dense<0.000000e+00> : vector<16x32xf32>
    %284 = tpu.matmul %281, %283, %cst_107 {dimension_numbers = #tpu.dot_dimension_numbers<[1], [0], [0], [1], [0, 0, 1, 1], [], []>} : vector<16x8xbf16>, vector<8x32xbf16>, vector<16x32xf32> -> vector<16x32xf32>
    %285 = arith.addf %255, %284 : vector<16x32xf32>
    %286 = vector.extract_strided_slice %254 {offsets = [0, 8], sizes = [16, 8], strides = [1, 1]} : vector<16x96xf32> to vector<16x8xf32>
    %287 = vector.shape_cast %286 : vector<16x8xf32> to vector<2x8x8xf32>
    %288 = arith.truncf %287 : vector<2x8x8xf32> to vector<2x8x8xbf16>
    %289 = vector.extract_strided_slice %254 {offsets = [0, 40], sizes = [16, 8], strides = [1, 1]} : vector<16x96xf32> to vector<16x8xf32>
    %290 = vector.shape_cast %289 : vector<16x8xf32> to vector<2x8x8xf32>
    %291 = arith.truncf %290 : vector<2x8x8xf32> to vector<2x8x8xbf16>
    %292 = vector.extract_strided_slice %254 {offsets = [0, 72], sizes = [16, 8], strides = [1, 1]} : vector<16x96xf32> to vector<16x8xf32>
    %293 = vector.shape_cast %292 : vector<16x8xf32> to vector<2x8x8xf32>
    %294 = arith.truncf %293 : vector<2x8x8xf32> to vector<2x8x8xbf16>
    "tpu.trace_start"() <{level = 10 : i32, message = "bqd,bkd->bqk"}> : () -> ()
    %cst_108 = arith.constant dense<0.000000e+00> : vector<2x8x8xf32>
    %295 = tpu.matmul %288, %291, %cst_108 {dimension_numbers = #tpu.dot_dimension_numbers<[2], [2], [1], [1], [0, 0, 0, 1, 1, 1], [0], [0]>} : vector<2x8x8xbf16>, vector<2x8x8xbf16>, vector<2x8x8xf32> -> vector<2x8x8xf32>
    "tpu.trace_stop"() : () -> ()
    %296 = vector.broadcast %30 : vector<2x1x8xf32> to vector<2x8x8xf32>
    %297 = arith.addf %295, %296 : vector<2x8x8xf32>
    %cst_109 = arith.constant dense<0xFF800000> : vector<2x8xf32>
    %298 = vector.multi_reduction <maximumf>, %297, %cst_109 [2] : vector<2x8x8xf32> to vector<2x8xf32>
    %299 = vector.shape_cast %298 : vector<2x8xf32> to vector<2x8x1xf32>
    %300 = vector.broadcast %299 : vector<2x8x1xf32> to vector<2x8x8xf32>
    %301 = arith.subf %297, %300 : vector<2x8x8xf32>
    %302 = math.exp %301 : vector<2x8x8xf32>
    %cst_110 = arith.constant dense<0.000000e+00> : vector<2x8xf32>
    %303 = vector.multi_reduction <add>, %302, %cst_110 [2] : vector<2x8x8xf32> to vector<2x8xf32>
    %304 = vector.shape_cast %303 : vector<2x8xf32> to vector<2x8x1xf32>
    %305 = tpu.reciprocal %304 {approx = true} : vector<2x8x1xf32> -> vector<2x8x1xf32>
    %306 = vector.broadcast %305 : vector<2x8x1xf32> to vector<2x8x8xf32>
    %307 = arith.mulf %302, %306 : vector<2x8x8xf32>
    %308 = arith.truncf %307 : vector<2x8x8xf32> to vector<2x8x8xbf16>
    "tpu.trace_start"() <{level = 10 : i32, message = "bqk,bkd->bqd"}> : () -> ()
    %cst_111 = arith.constant dense<0.000000e+00> : vector<2x8x8xf32>
    %309 = tpu.matmul %308, %294, %cst_111 {dimension_numbers = #tpu.dot_dimension_numbers<[2], [1], [1], [2], [0, 0, 0, 1, 1, 2], [0], [0]>} : vector<2x8x8xbf16>, vector<2x8x8xbf16>, vector<2x8x8xf32> -> vector<2x8x8xf32>
    "tpu.trace_stop"() : () -> ()
    %310 = vector.shape_cast %309 : vector<2x8x8xf32> to vector<16x8xf32>
    %311 = arith.truncf %310 : vector<16x8xf32> to vector<16x8xbf16>
    %c5 = arith.constant 5 : index
    %c0_112 = arith.constant 0 : index
    %c0_113 = arith.constant 0 : index
    %312 = vector.load %arg7[%c5, %c0_112, %c0_113] : memref<8x8x32xbf16, #tpu.memory_space<vmem>>, vector<1x8x32xbf16>
    %313 = vector.shape_cast %312 : vector<1x8x32xbf16> to vector<8x32xbf16>
    %cst_114 = arith.constant dense<0.000000e+00> : vector<16x32xf32>
    %314 = tpu.matmul %311, %313, %cst_114 {dimension_numbers = #tpu.dot_dimension_numbers<[1], [0], [0], [1], [0, 0, 1, 1], [], []>} : vector<16x8xbf16>, vector<8x32xbf16>, vector<16x32xf32> -> vector<16x32xf32>
    %315 = arith.addf %285, %314 : vector<16x32xf32>
    %316 = vector.extract_strided_slice %254 {offsets = [0, 16], sizes = [16, 8], strides = [1, 1]} : vector<16x96xf32> to vector<16x8xf32>
    %317 = vector.shape_cast %316 : vector<16x8xf32> to vector<2x8x8xf32>
    %318 = arith.truncf %317 : vector<2x8x8xf32> to vector<2x8x8xbf16>
    %319 = vector.extract_strided_slice %254 {offsets = [0, 48], sizes = [16, 8], strides = [1, 1]} : vector<16x96xf32> to vector<16x8xf32>
    %320 = vector.shape_cast %319 : vector<16x8xf32> to vector<2x8x8xf32>
    %321 = arith.truncf %320 : vector<2x8x8xf32> to vector<2x8x8xbf16>
    %322 = vector.extract_strided_slice %254 {offsets = [0, 80], sizes = [16, 8], strides = [1, 1]} : vector<16x96xf32> to vector<16x8xf32>
    %323 = vector.shape_cast %322 : vector<16x8xf32> to vector<2x8x8xf32>
    %324 = arith.truncf %323 : vector<2x8x8xf32> to vector<2x8x8xbf16>
    "tpu.trace_start"() <{level = 10 : i32, message = "bqd,bkd->bqk"}> : () -> ()
    %cst_115 = arith.constant dense<0.000000e+00> : vector<2x8x8xf32>
    %325 = tpu.matmul %318, %321, %cst_115 {dimension_numbers = #tpu.dot_dimension_numbers<[2], [2], [1], [1], [0, 0, 0, 1, 1, 1], [0], [0]>} : vector<2x8x8xbf16>, vector<2x8x8xbf16>, vector<2x8x8xf32> -> vector<2x8x8xf32>
    "tpu.trace_stop"() : () -> ()
    %326 = vector.broadcast %30 : vector<2x1x8xf32> to vector<2x8x8xf32>
    %327 = arith.addf %325, %326 : vector<2x8x8xf32>
    %cst_116 = arith.constant dense<0xFF800000> : vector<2x8xf32>
    %328 = vector.multi_reduction <maximumf>, %327, %cst_116 [2] : vector<2x8x8xf32> to vector<2x8xf32>
    %329 = vector.shape_cast %328 : vector<2x8xf32> to vector<2x8x1xf32>
    %330 = vector.broadcast %329 : vector<2x8x1xf32> to vector<2x8x8xf32>
    %331 = arith.subf %327, %330 : vector<2x8x8xf32>
    %332 = math.exp %331 : vector<2x8x8xf32>
    %cst_117 = arith.constant dense<0.000000e+00> : vector<2x8xf32>
    %333 = vector.multi_reduction <add>, %332, %cst_117 [2] : vector<2x8x8xf32> to vector<2x8xf32>
    %334 = vector.shape_cast %333 : vector<2x8xf32> to vector<2x8x1xf32>
    %335 = tpu.reciprocal %334 {approx = true} : vector<2x8x1xf32> -> vector<2x8x1xf32>
    %336 = vector.broadcast %335 : vector<2x8x1xf32> to vector<2x8x8xf32>
    %337 = arith.mulf %332, %336 : vector<2x8x8xf32>
    %338 = arith.truncf %337 : vector<2x8x8xf32> to vector<2x8x8xbf16>
    "tpu.trace_start"() <{level = 10 : i32, message = "bqk,bkd->bqd"}> : () -> ()
    %cst_118 = arith.constant dense<0.000000e+00> : vector<2x8x8xf32>
    %339 = tpu.matmul %338, %324, %cst_118 {dimension_numbers = #tpu.dot_dimension_numbers<[2], [1], [1], [2], [0, 0, 0, 1, 1, 2], [0], [0]>} : vector<2x8x8xbf16>, vector<2x8x8xbf16>, vector<2x8x8xf32> -> vector<2x8x8xf32>
    "tpu.trace_stop"() : () -> ()
    %340 = vector.shape_cast %339 : vector<2x8x8xf32> to vector<16x8xf32>
    %341 = arith.truncf %340 : vector<16x8xf32> to vector<16x8xbf16>
    %c6 = arith.constant 6 : index
    %c0_119 = arith.constant 0 : index
    %c0_120 = arith.constant 0 : index
    %342 = vector.load %arg7[%c6, %c0_119, %c0_120] : memref<8x8x32xbf16, #tpu.memory_space<vmem>>, vector<1x8x32xbf16>
    %343 = vector.shape_cast %342 : vector<1x8x32xbf16> to vector<8x32xbf16>
    %cst_121 = arith.constant dense<0.000000e+00> : vector<16x32xf32>
    %344 = tpu.matmul %341, %343, %cst_121 {dimension_numbers = #tpu.dot_dimension_numbers<[1], [0], [0], [1], [0, 0, 1, 1], [], []>} : vector<16x8xbf16>, vector<8x32xbf16>, vector<16x32xf32> -> vector<16x32xf32>
    %345 = arith.addf %315, %344 : vector<16x32xf32>
    %346 = vector.extract_strided_slice %254 {offsets = [0, 24], sizes = [16, 8], strides = [1, 1]} : vector<16x96xf32> to vector<16x8xf32>
    %347 = vector.shape_cast %346 : vector<16x8xf32> to vector<2x8x8xf32>
    %348 = arith.truncf %347 : vector<2x8x8xf32> to vector<2x8x8xbf16>
    %349 = vector.extract_strided_slice %254 {offsets = [0, 56], sizes = [16, 8], strides = [1, 1]} : vector<16x96xf32> to vector<16x8xf32>
    %350 = vector.shape_cast %349 : vector<16x8xf32> to vector<2x8x8xf32>
    %351 = arith.truncf %350 : vector<2x8x8xf32> to vector<2x8x8xbf16>
    %352 = vector.extract_strided_slice %254 {offsets = [0, 88], sizes = [16, 8], strides = [1, 1]} : vector<16x96xf32> to vector<16x8xf32>
    %353 = vector.shape_cast %352 : vector<16x8xf32> to vector<2x8x8xf32>
    %354 = arith.truncf %353 : vector<2x8x8xf32> to vector<2x8x8xbf16>
    "tpu.trace_start"() <{level = 10 : i32, message = "bqd,bkd->bqk"}> : () -> ()
    %cst_122 = arith.constant dense<0.000000e+00> : vector<2x8x8xf32>
    %355 = tpu.matmul %348, %351, %cst_122 {dimension_numbers = #tpu.dot_dimension_numbers<[2], [2], [1], [1], [0, 0, 0, 1, 1, 1], [0], [0]>} : vector<2x8x8xbf16>, vector<2x8x8xbf16>, vector<2x8x8xf32> -> vector<2x8x8xf32>
    "tpu.trace_stop"() : () -> ()
    %356 = vector.broadcast %30 : vector<2x1x8xf32> to vector<2x8x8xf32>
    %357 = arith.addf %355, %356 : vector<2x8x8xf32>
    %cst_123 = arith.constant dense<0xFF800000> : vector<2x8xf32>
    %358 = vector.multi_reduction <maximumf>, %357, %cst_123 [2] : vector<2x8x8xf32> to vector<2x8xf32>
    %359 = vector.shape_cast %358 : vector<2x8xf32> to vector<2x8x1xf32>
    %360 = vector.broadcast %359 : vector<2x8x1xf32> to vector<2x8x8xf32>
    %361 = arith.subf %357, %360 : vector<2x8x8xf32>
    %362 = math.exp %361 : vector<2x8x8xf32>
    %cst_124 = arith.constant dense<0.000000e+00> : vector<2x8xf32>
    %363 = vector.multi_reduction <add>, %362, %cst_124 [2] : vector<2x8x8xf32> to vector<2x8xf32>
    %364 = vector.shape_cast %363 : vector<2x8xf32> to vector<2x8x1xf32>
    %365 = tpu.reciprocal %364 {approx = true} : vector<2x8x1xf32> -> vector<2x8x1xf32>
    %366 = vector.broadcast %365 : vector<2x8x1xf32> to vector<2x8x8xf32>
    %367 = arith.mulf %362, %366 : vector<2x8x8xf32>
    %368 = arith.truncf %367 : vector<2x8x8xf32> to vector<2x8x8xbf16>
    "tpu.trace_start"() <{level = 10 : i32, message = "bqk,bkd->bqd"}> : () -> ()
    %cst_125 = arith.constant dense<0.000000e+00> : vector<2x8x8xf32>
    %369 = tpu.matmul %368, %354, %cst_125 {dimension_numbers = #tpu.dot_dimension_numbers<[2], [1], [1], [2], [0, 0, 0, 1, 1, 2], [0], [0]>} : vector<2x8x8xbf16>, vector<2x8x8xbf16>, vector<2x8x8xf32> -> vector<2x8x8xf32>
    "tpu.trace_stop"() : () -> ()
    %370 = vector.shape_cast %369 : vector<2x8x8xf32> to vector<16x8xf32>
    %371 = arith.truncf %370 : vector<16x8xf32> to vector<16x8xbf16>
    %c7 = arith.constant 7 : index
    %c0_126 = arith.constant 0 : index
    %c0_127 = arith.constant 0 : index
    %372 = vector.load %arg7[%c7, %c0_126, %c0_127] : memref<8x8x32xbf16, #tpu.memory_space<vmem>>, vector<1x8x32xbf16>
    %373 = vector.shape_cast %372 : vector<1x8x32xbf16> to vector<8x32xbf16>
    %cst_128 = arith.constant dense<0.000000e+00> : vector<16x32xf32>
    %374 = tpu.matmul %371, %373, %cst_128 {dimension_numbers = #tpu.dot_dimension_numbers<[1], [0], [0], [1], [0, 0, 1, 1], [], []>} : vector<16x8xbf16>, vector<8x32xbf16>, vector<16x32xf32> -> vector<16x32xf32>
    %375 = arith.addf %345, %374 : vector<16x32xf32>
    %c1_129 = arith.constant 1 : index
    %c0_130 = arith.constant 0 : index
    %c0_131 = arith.constant 0 : index
    %376 = vector.load %arg8[%c1_129, %c0_130, %c0_131] : memref<2x1x32xf32, #tpu.memory_space<vmem>>, vector<1x1x32xf32>
    %377 = vector.shape_cast %376 : vector<1x1x32xf32> to vector<1x32xf32>
    %378 = vector.broadcast %377 : vector<1x32xf32> to vector<16x32xf32>
    %379 = arith.addf %375, %378 : vector<16x32xf32>
    %380 = arith.addf %379, %246 : vector<16x32xf32>
    %c1_132 = arith.constant 1 : index
    %c0_133 = arith.constant 0 : index
    %c0_134 = arith.constant 0 : index
    %381 = vector.load %arg9[%c1_132, %c0_133, %c0_134] : memref<2x1x32xf32, #tpu.memory_space<vmem>>, vector<1x1x32xf32>
    %382 = vector.shape_cast %381 : vector<1x1x32xf32> to vector<1x32xf32>
    %c1_135 = arith.constant 1 : index
    %c0_136 = arith.constant 0 : index
    %c0_137 = arith.constant 0 : index
    %383 = vector.load %arg10[%c1_135, %c0_136, %c0_137] : memref<2x1x32xf32, #tpu.memory_space<vmem>>, vector<1x1x32xf32>
    %384 = vector.shape_cast %383 : vector<1x1x32xf32> to vector<1x32xf32>
    %cst_138 = arith.constant dense<0.000000e+00> : vector<16xf32>
    %385 = vector.multi_reduction <add>, %380, %cst_138 [1] : vector<16x32xf32> to vector<16xf32>
    %386 = vector.shape_cast %385 : vector<16xf32> to vector<16x1xf32>
    %cst_139 = arith.constant 3.200000e+01 : f32
    %387 = vector.broadcast %cst_139 : f32 to vector<16x1xf32>
    %388 = arith.divf %386, %387 : vector<16x1xf32>
    %389 = vector.broadcast %388 : vector<16x1xf32> to vector<16x32xf32>
    %390 = arith.subf %380, %389 : vector<16x32xf32>
    %391 = arith.mulf %390, %390 : vector<16x32xf32>
    %cst_140 = arith.constant dense<0.000000e+00> : vector<16xf32>
    %392 = vector.multi_reduction <add>, %391, %cst_140 [1] : vector<16x32xf32> to vector<16xf32>
    %393 = vector.shape_cast %392 : vector<16xf32> to vector<16x1xf32>
    %cst_141 = arith.constant 3.200000e+01 : f32
    %394 = vector.broadcast %cst_141 : f32 to vector<16x1xf32>
    %395 = arith.divf %393, %394 : vector<16x1xf32>
    %396 = vector.broadcast %388 : vector<16x1xf32> to vector<16x32xf32>
    %397 = arith.subf %380, %396 : vector<16x32xf32>
    %cst_142 = arith.constant 9.99999974E-6 : f32
    %398 = vector.broadcast %cst_142 : f32 to vector<16x1xf32>
    %399 = arith.addf %395, %398 : vector<16x1xf32>
    %400 = math.rsqrt %399 : vector<16x1xf32>
    %401 = vector.broadcast %400 : vector<16x1xf32> to vector<16x32xf32>
    %402 = arith.mulf %397, %401 : vector<16x32xf32>
    %403 = vector.broadcast %382 : vector<1x32xf32> to vector<16x32xf32>
    %404 = arith.mulf %402, %403 : vector<16x32xf32>
    %405 = vector.broadcast %384 : vector<1x32xf32> to vector<16x32xf32>
    %406 = arith.addf %404, %405 : vector<16x32xf32>
    %407 = arith.truncf %406 : vector<16x32xf32> to vector<16x32xbf16>
    %c1_143 = arith.constant 1 : index
    %c0_144 = arith.constant 0 : index
    %c0_145 = arith.constant 0 : index
    %408 = vector.load %arg11[%c1_143, %c0_144, %c0_145] : memref<2x32x64xbf16, #tpu.memory_space<vmem>>, vector<1x32x64xbf16>
    %409 = vector.shape_cast %408 : vector<1x32x64xbf16> to vector<32x64xbf16>
    %cst_146 = arith.constant dense<0.000000e+00> : vector<16x64xf32>
    %410 = tpu.matmul %407, %409, %cst_146 {dimension_numbers = #tpu.dot_dimension_numbers<[1], [0], [0], [1], [0, 0, 1, 1], [], []>} : vector<16x32xbf16>, vector<32x64xbf16>, vector<16x64xf32> -> vector<16x64xf32>
    %c1_147 = arith.constant 1 : index
    %c0_148 = arith.constant 0 : index
    %c0_149 = arith.constant 0 : index
    %411 = vector.load %arg12[%c1_147, %c0_148, %c0_149] : memref<2x1x64xf32, #tpu.memory_space<vmem>>, vector<1x1x64xf32>
    %412 = vector.shape_cast %411 : vector<1x1x64xf32> to vector<1x64xf32>
    %413 = vector.broadcast %412 : vector<1x64xf32> to vector<16x64xf32>
    %414 = arith.addf %410, %413 : vector<16x64xf32>
    %415 = arith.mulf %414, %414 : vector<16x64xf32>
    %416 = arith.mulf %414, %415 : vector<16x64xf32>
    %cst_150 = arith.constant 4.471500e-02 : f32
    %417 = vector.broadcast %cst_150 : f32 to vector<16x64xf32>
    %418 = arith.mulf %417, %416 : vector<16x64xf32>
    %419 = arith.addf %414, %418 : vector<16x64xf32>
    %cst_151 = arith.constant 0.797884583 : f32
    %420 = vector.broadcast %cst_151 : f32 to vector<16x64xf32>
    %421 = arith.mulf %420, %419 : vector<16x64xf32>
    %422 = math.tanh %421 : vector<16x64xf32>
    %cst_152 = arith.constant 1.000000e+00 : f32
    %423 = vector.broadcast %cst_152 : f32 to vector<16x64xf32>
    %424 = arith.addf %423, %422 : vector<16x64xf32>
    %cst_153 = arith.constant 5.000000e-01 : f32
    %425 = vector.broadcast %cst_153 : f32 to vector<16x64xf32>
    %426 = arith.mulf %425, %424 : vector<16x64xf32>
    %427 = arith.mulf %414, %426 : vector<16x64xf32>
    %428 = arith.truncf %427 : vector<16x64xf32> to vector<16x64xbf16>
    %c1_154 = arith.constant 1 : index
    %c0_155 = arith.constant 0 : index
    %c0_156 = arith.constant 0 : index
    %429 = vector.load %arg13[%c1_154, %c0_155, %c0_156] : memref<2x64x32xbf16, #tpu.memory_space<vmem>>, vector<1x64x32xbf16>
    %430 = vector.shape_cast %429 : vector<1x64x32xbf16> to vector<64x32xbf16>
    %cst_157 = arith.constant dense<0.000000e+00> : vector<16x32xf32>
    %431 = tpu.matmul %428, %430, %cst_157 {dimension_numbers = #tpu.dot_dimension_numbers<[1], [0], [0], [1], [0, 0, 1, 1], [], []>} : vector<16x64xbf16>, vector<64x32xbf16>, vector<16x32xf32> -> vector<16x32xf32>
    %c1_158 = arith.constant 1 : index
    %c0_159 = arith.constant 0 : index
    %c0_160 = arith.constant 0 : index
    %432 = vector.load %arg14[%c1_158, %c0_159, %c0_160] : memref<2x1x32xf32, #tpu.memory_space<vmem>>, vector<1x1x32xf32>
    %433 = vector.shape_cast %432 : vector<1x1x32xf32> to vector<1x32xf32>
    %434 = vector.broadcast %433 : vector<1x32xf32> to vector<16x32xf32>
    %435 = arith.addf %431, %434 : vector<16x32xf32>
    %436 = arith.addf %435, %406 : vector<16x32xf32>
    %c1_161 = arith.constant 1 : index
    %c0_162 = arith.constant 0 : index
    %c0_163 = arith.constant 0 : index
    %437 = vector.load %arg15[%c1_161, %c0_162, %c0_163] : memref<2x1x32xf32, #tpu.memory_space<vmem>>, vector<1x1x32xf32>
    %438 = vector.shape_cast %437 : vector<1x1x32xf32> to vector<1x32xf32>
    %c1_164 = arith.constant 1 : index
    %c0_165 = arith.constant 0 : index
    %c0_166 = arith.constant 0 : index
    %439 = vector.load %arg16[%c1_164, %c0_165, %c0_166] : memref<2x1x32xf32, #tpu.memory_space<vmem>>, vector<1x1x32xf32>
    %440 = vector.shape_cast %439 : vector<1x1x32xf32> to vector<1x32xf32>
    %cst_167 = arith.constant dense<0.000000e+00> : vector<16xf32>
    %441 = vector.multi_reduction <add>, %436, %cst_167 [1] : vector<16x32xf32> to vector<16xf32>
    %442 = vector.shape_cast %441 : vector<16xf32> to vector<16x1xf32>
    %cst_168 = arith.constant 3.200000e+01 : f32
    %443 = vector.broadcast %cst_168 : f32 to vector<16x1xf32>
    %444 = arith.divf %442, %443 : vector<16x1xf32>
    %445 = vector.broadcast %444 : vector<16x1xf32> to vector<16x32xf32>
    %446 = arith.subf %436, %445 : vector<16x32xf32>
    %447 = arith.mulf %446, %446 : vector<16x32xf32>
    %cst_169 = arith.constant dense<0.000000e+00> : vector<16xf32>
    %448 = vector.multi_reduction <add>, %447, %cst_169 [1] : vector<16x32xf32> to vector<16xf32>
    %449 = vector.shape_cast %448 : vector<16xf32> to vector<16x1xf32>
    %cst_170 = arith.constant 3.200000e+01 : f32
    %450 = vector.broadcast %cst_170 : f32 to vector<16x1xf32>
    %451 = arith.divf %449, %450 : vector<16x1xf32>
    %452 = vector.broadcast %444 : vector<16x1xf32> to vector<16x32xf32>
    %453 = arith.subf %436, %452 : vector<16x32xf32>
    %cst_171 = arith.constant 9.99999974E-6 : f32
    %454 = vector.broadcast %cst_171 : f32 to vector<16x1xf32>
    %455 = arith.addf %451, %454 : vector<16x1xf32>
    %456 = math.rsqrt %455 : vector<16x1xf32>
    %457 = vector.broadcast %456 : vector<16x1xf32> to vector<16x32xf32>
    %458 = arith.mulf %453, %457 : vector<16x32xf32>
    %459 = vector.broadcast %438 : vector<1x32xf32> to vector<16x32xf32>
    %460 = arith.mulf %458, %459 : vector<16x32xf32>
    %461 = vector.broadcast %440 : vector<1x32xf32> to vector<16x32xf32>
    %462 = arith.addf %460, %461 : vector<16x32xf32>
    %463 = vector.shape_cast %462 : vector<16x32xf32> to vector<2x8x32xf32>
    %464 = vector.extract_strided_slice %463 {offsets = [0, 0, 0], sizes = [2, 1, 32], strides = [1, 1, 1]} : vector<2x8x32xf32> to vector<2x1x32xf32>
    %465 = vector.shape_cast %464 : vector<2x1x32xf32> to vector<2x32xf32>
    %466 = arith.truncf %465 : vector<2x32xf32> to vector<2x32xbf16>
    %c0_172 = arith.constant 0 : index
    %c0_173 = arith.constant 0 : index
    %467 = vector.load %arg17[%c0_172, %c0_173] : memref<32x32xbf16, #tpu.memory_space<vmem>>, vector<32x32xbf16>
    %cst_174 = arith.constant dense<0.000000e+00> : vector<2x32xf32>
    %468 = tpu.matmul %466, %467, %cst_174 {dimension_numbers = #tpu.dot_dimension_numbers<[1], [0], [0], [1], [0, 0, 1, 1], [], []>} : vector<2x32xbf16>, vector<32x32xbf16>, vector<2x32xf32> -> vector<2x32xf32>
    %c0_175 = arith.constant 0 : index
    %c0_176 = arith.constant 0 : index
    %469 = vector.load %arg18[%c0_175, %c0_176] : memref<1x32xf32, #tpu.memory_space<vmem>>, vector<1x32xf32>
    %470 = vector.broadcast %469 : vector<1x32xf32> to vector<2x32xf32>
    %471 = arith.addf %468, %470 : vector<2x32xf32>
    %472 = math.tanh %471 : vector<2x32xf32>
    %473 = arith.truncf %472 : vector<2x32xf32> to vector<2x32xbf16>
    %c0_177 = arith.constant 0 : index
    %c0_178 = arith.constant 0 : index
    %474 = vector.load %arg19[%c0_177, %c0_178] : memref<32x3xbf16, #tpu.memory_space<vmem>>, vector<32x3xbf16>
    %cst_179 = arith.constant dense<0.000000e+00> : vector<2x3xf32>
    %475 = tpu.matmul %473, %474, %cst_179 {dimension_numbers = #tpu.dot_dimension_numbers<[1], [0], [0], [1], [0, 0, 1, 1], [], []>} : vector<2x32xbf16>, vector<32x3xbf16>, vector<2x3xf32> -> vector<2x3xf32>
    %c0_180 = arith.constant 0 : index
    %c0_181 = arith.constant 0 : index
    %476 = vector.load %arg20[%c0_180, %c0_181] : memref<1x3xf32, #tpu.memory_space<vmem>>, vector<1x3xf32>
    %477 = vector.broadcast %476 : vector<1x3xf32> to vector<2x3xf32>
    %478 = arith.addf %475, %477 : vector<2x3xf32>
    %c0_182 = arith.constant 0 : index
    %c0_183 = arith.constant 0 : index
    %479 = vector.load %arg21[%c0_182, %c0_183] : memref<3x1xf32, #tpu.memory_space<vmem>>, vector<3x1xf32>
    %cst_184 = arith.constant dense<0.000000e+00> : vector<2x1xf32>
    %480 = tpu.matmul %478, %479, %cst_184 {dimension_numbers = #tpu.dot_dimension_numbers<[1], [0], [0], [1], [0, 0, 1, 1], [], []>} : vector<2x3xf32>, vector<3x1xf32>, vector<2x1xf32> -> vector<2x1xf32>
    %c0_185 = arith.constant 0 : index
    %c0_186 = arith.constant 0 : index
    %481 = vector.load %arg2[%c0_185, %c0_186] : memref<2x1xf32, #tpu.memory_space<vmem>>, vector<2x1xf32>
    %c0_187 = arith.constant 0 : index
    %c0_188 = arith.constant 0 : index
    %482 = vector.load %arg22[%c0_187, %c0_188] : memref<1x1xf32, #tpu.memory_space<vmem>>, vector<1x1xf32>
    %483 = vector.broadcast %482 : vector<1x1xf32> to vector<2x1xf32>
    %484 = arith.mulf %481, %483 : vector<2x1xf32>
    %485 = arith.addf %480, %484 : vector<2x1xf32>
    %c0_189 = arith.constant 0 : index
    %c0_190 = arith.constant 0 : index
    %486 = vector.load %arg23[%c0_189, %c0_190] : memref<1x1xf32, #tpu.memory_space<vmem>>, vector<1x1xf32>
    %487 = vector.broadcast %486 : vector<1x1xf32> to vector<2x1xf32>
    %488 = arith.addf %485, %487 : vector<2x1xf32>
    %c0_191 = arith.constant 0 : index
    %c0_192 = arith.constant 0 : index
    %489 = vector.load %arg24[%c0_191, %c0_192] : memref<2x1xf32, #tpu.memory_space<vmem>>, vector<2x1xf32>
    tpu.vector_store %arg24[%c0_191, %c0_192], %488 {strides = array<i32>} : memref<2x1xf32, #tpu.memory_space<vmem>>, vector<2x1xf32>,
    return
  }
}

</mosaic_0001>

<bundles_post_ra>
// kernel: tpu_custom_call.1
= control target key start
LH: loop header
LB: loop body
LE: loop exit
PB: predicated region body
PF: predicated region fallthrough
CT: control target
= control target key end

     0   :  { %s3204_s0 = inlined_call_operand.hbm [shape: f32[16,32], index: 0, kind: input, shape index: {}]   ;;  %s3205_s1 = inlined_call_operand.vmem [shape: f32[2,8], index: 1, kind: input, shape index: {}]   ;;  %s3206_s2 = inlined_call_operand.vmem [shape: f32[2,1], index: 2, kind: input, shape index: {}]   ;;  %s3207_s3 = inlined_call_operand.hbm [shape: f32[1,32], index: 3, kind: input, shape index: {}]   ;;  %s3208_s4 = inlined_call_operand.hbm [shape: f32[1,32], index: 4, kind: input, shape index: {}]   ;;  %s3209_s5 = inlined_call_operand.vmem [shape: bf16[2,32,96], index: 5, kind: input, shape index: {}]   ;;  %s3210_s6 = inlined_call_operand.vmem [shape: f32[2,1,96], index: 6, kind: input, shape index: {}]   ;;  %s3211_s7 = inlined_call_operand.vmem [shape: bf16[8,8,32], index: 7, kind: input, shape index: {}]   ;;  %s3212_s8 = inlined_call_operand.vmem [shape: f32[2,1,32], index: 8, kind: input, shape index: {}]   ;;  %s3213_s9 = inlined_call_operand.vmem [shape: f32[2,1,32], index: 9, kind: input, shape index: {}]   ;;  %s3214_s10 = inlined_call_operand.hbm [shape: f32[2,1,32], index: 10, kind: input, shape index: {}]   ;;  %s3215_s11 = inlined_call_operand.vmem [shape: bf16[2,32,64], index: 11, kind: input, shape index: {}]   ;;  %s3216_s12 = inlined_call_operand.hbm [shape: f32[2,1,64], index: 12, kind: input, shape index: {}]   ;;  %s3217_s13 = inlined_call_operand.vmem [shape: bf16[2,64,32], index: 13, kind: input, shape index: {}]   ;;  %s3218_s14 = inlined_call_operand.hbm [shape: f32[2,1,32], index: 14, kind: input, shape index: {}]   ;;  %s3219_s15 = inlined_call_operand.hbm [shape: f32[2,1,32], index: 15, kind: input, shape index: {}]   ;;  %s3220_s16 = inlined_call_operand.vmem [shape: f32[2,1,32], index: 16, kind: input, shape index: {}]   ;;  %s3221_s17 = inlined_call_operand.hbm [shape: bf16[32,32], index: 17, kind: input, shape index: {}]   ;;  %s3222_s18 = inlined_call_operand.vmem [shape: f32[1,32], index: 18, kind: input, shape index: {}]   ;;  %s3223_s19 = inlined_call_operand.vmem [shape: bf16[32,3], index: 19, kind: input, shape index: {}]   ;;  %s3224_s20 = inlined_call_operand.vmem [shape: f32[1,3], index: 20, kind: input, shape index: {}]   ;;  %s3225_s21 = inlined_call_operand.vmem [shape: f32[3,1], index: 21, kind: input, shape index: {}]   ;;  %s3226_s22 = inlined_call_operand.<no memory space> [shape: f32[1,1], index: 22, kind: input, shape index: {}]   ;;  %s3227_s24 = inlined_call_operand.vmem [shape: f32[2,1], index: 24, kind: output, shape index: {}]   ;;  %s3228_s23 = inlined_call_operand.<no memory space> [shape: f32[1,1], index: 23, kind: input, shape index: {}]  }
   0x1   :  { %3235 = sst [smem:[#allocation22_spill]] %s3204_s0  ;;  %v29_v0 = vstv %s3226_s22  ;;  %v31_v1 = vstv %s3228_s23 }
   0x2   :  { %3236 = sst [smem:[#allocation23_spill]] %s3205_s1  ;;  %30 = vst [vmem:[#allocation2] sm:$0x1] %v29_v0 }
   0x3   :  { %3237 = sst [smem:[#allocation24_spill]] %s3206_s2  ;;  %32 = vst [vmem:[#allocation3] sm:$0x1] %v31_v1 }
   0x4   :  { %3238 = sst [smem:[#allocation25_spill]] %s3207_s3 }
   0x5   :  { %3239 = sst [smem:[#allocation26_spill]] %s3208_s4 }
   0x6   :  { %3240 = sst [smem:[#allocation27_spill]] %s3209_s5 }
   0x7   :  { %3241 = sst [smem:[#allocation28_spill]] %s3210_s6 }
   0x8   :  { %3242 = sst [smem:[#allocation29_spill]] %s3211_s7 }
   0x9   :  { %3243 = sst [smem:[#allocation30_spill]] %s3212_s8 }
   0xa   :  { %33 = vsyncpa [#allocation5], 0 }
   0xb   :  { %34 = vsyncpa [#allocation7], 0 }
   0xc   :  { %35 = vsyncpa [#allocation10], 0 }
   0xd   :  { %36 = vsyncpa [#allocation13], 0  ;;  %s3244_s29 = sld [smem:[#allocation25_spill]] }
  0x13   :  { %s60_s0 = sshll.u32 %s3244_s29, 4  ;;  %s61_s0 = int_to_ptr.hbm [resolvable:$true] %s60_s0 }
  0x14   :  { %37 = vsyncpa [#allocation16], 0  ;;  %s2584_s7 = smov [#allocation6]   ;;  %s91_s25 = sshll.u32 %s3214_s10, 4  ;;  %s92_s25 = int_to_ptr.hbm [resolvable:$true] %s91_s25 }
  0x15   :  { %s62_s30 = sshll.u32 %s2584_s7, 4  ;;  %s2585_s23 = smov [#allocation9]   ;;  %s63_s30 = int_to_ptr.vmem [resolvable:$true] %s62_s30 }
  0x16   :  { %65 = dma.hbm_to_vmem [thread:$0]  %s61_s0, 16, %s63_s30, [#allocation7]  }
  0x17   :  { %s93_s8 = sshll.u32 %s2585_s23, 4  ;;  %s2586_s4 = smov 16   ;;  %s94_s8 = int_to_ptr.vmem [resolvable:$true] %s93_s8 }
  0x18   :  { %s2587_s1 = smov 1   ;;  %s121_s27 = sshll.u32 %s3218_s14, 4  ;;  %s122_s27 = int_to_ptr.hbm [resolvable:$true] %s121_s27 }
  0x19   :  { %99 = dma.hbm_to_vmem [thread:$0]  %s92_s25, 32, %s94_s8, [#allocation10], %s2586_s4, %s2586_s4, %s2587_s1  }
  0x1a   :  { %s2588_s28 = smov [#allocation12]   ;;  %s3245_s29 = sld [smem:[#allocation22_spill]] }
  0x1b   :  { %s123_s6 = sshll.u32 %s2588_s28, 4  ;;  %s2589_s7 = smov [#allocation4]   ;;  %s124_s6 = int_to_ptr.vmem [resolvable:$true] %s123_s6 }
  0x1c   :  { %129 = dma.hbm_to_vmem [thread:$0]  %s122_s27, 32, %s124_s6, [#allocation13], %s2586_s4, %s2586_s4, %s2587_s1  }
  0x1d   :  { %s44_s30 = sshll.u32 %s2589_s7, 4  ;;  %s2590_s22 = smov 128   ;;  %s45_s30 = int_to_ptr.vmem [resolvable:$true] %s44_s30 }
  0x1e   :  { %s2591_s3 = smov 8   ;;  %s3246_s23 = sld [smem:[#allocation26_spill]] }
  0x1f   :  { %s2592_s5 = smov [#allocation8]   ;;  %s106_s2 = sshll.u32 %s3216_s12, 4  ;;  %s107_s2 = int_to_ptr.hbm [resolvable:$true] %s106_s2 }
  0x20   :  { %s42_s0 = sshll.u32 %s3245_s29, 4  ;;  %s73_s26 = sshll.u32 %s2592_s5, 4  ;;  %s43_s0 = int_to_ptr.hbm [resolvable:$true] %s42_s0  ;;  %s74_s26 = int_to_ptr.vmem [resolvable:$true] %s73_s26 }
  0x21   :  { %50 = dma.hbm_to_vmem [thread:$0]  %s43_s0, 256, %s45_s30, [#allocation5], %s2590_s22, %s2590_s22, %s2591_s3  }
  0x22   :  { %s2593_s27 = smov [#allocation11]   ;;  %s134_s0 = sshll.u32 %s3219_s15, 4  ;;  %s135_s0 = int_to_ptr.hbm [resolvable:$true] %s134_s0 }
  0x23   :  { %s108_s6 = sshll.u32 %s2593_s27, 4  ;;  %s149_s3 = sshll.u32 %s3221_s17, 4  ;;  %s109_s6 = int_to_ptr.vmem [resolvable:$true] %s108_s6  ;;  %s150_s3 = int_to_ptr.hbm [resolvable:$true] %s149_s3 }
  0x24   :  { %s71_s8 = sshll.u32 %s3246_s23, 4  ;;  %s2594_s14 = smov [#allocation14]   ;;  %s72_s8 = int_to_ptr.hbm [resolvable:$true] %s71_s8 }
  0x25   :  { %76 = dma.hbm_to_vmem [thread:$0]  %s72_s8, 16, %s74_s26, [#allocation7]  }
  0x26   :  { %114 = dma.hbm_to_vmem [thread:$0]  %s107_s2, 32, %s109_s6, [#allocation10], %s2586_s4, %s2586_s4, %s2587_s1  }
  0x27   :  { %s136_s12 = sshll.u32 %s2594_s14, 4  ;;  %s2595_s25 = smov [#allocation15]   ;;  %s137_s12 = int_to_ptr.vmem [resolvable:$true] %s136_s12 }
  0x28   :  { %142 = dma.hbm_to_vmem [thread:$0]  %s135_s0, 32, %s137_s12, [#allocation13], %s2586_s4, %s2586_s4, %s2587_s1  }
  0x29   :  { %s151_s15 = sshll.u32 %s2595_s25, 4  ;;  %s2596_s23 = smov 64   ;;  %s152_s15 = int_to_ptr.vmem [resolvable:$true] %s151_s15 }
  0x2a   :  { %s2597_s8 = smov 4  }
  0x2b   :  { %157 = dma.hbm_to_vmem [thread:$0]  %s150_s3, 256, %s152_s15, [#allocation16], %s2596_s23, %s2596_s23, %s2597_s8  }
  0x2c   :  { %2574 = dma.done.wait [#allocation5], 256  }
  0x2d   :  { %2575 = vsyncadd [#allocation5], 4294967040 }
  0x2e   :  { %2576 = dma.done.wait [#allocation7], 32  }
  0x2f   :  { %2577 = vsyncadd [#allocation7], 4294967264 }
  0x30   :  { %2578 = dma.done.wait [#allocation10], 64  }
  0x31   :  { %2579 = vsyncadd [#allocation10], 4294967232 }
  0x32   :  { %2580 = dma.done.wait [#allocation13], 64  }
  0x33   :  { %2581 = vsyncadd [#allocation13], 4294967232 }
  0x34   :  { %2582 = dma.done.wait [#allocation16], 256  }
  0x35   :  { %2583 = vsyncadd [#allocation16], 4294967040  ;;  %vm207_vm0 = vcmask 261120   ;;  %v203_v2 = vld [vmem:[#allocation4] sm:$0xff]  ;;  %v204_v3 = vld [vmem:[#allocation4 + $0x8] sm:$0xff]  ;;  %v2598_v6 = vmov 32.0  }
  0x36   :  { %v208_v4 = vsel %vm207_vm0, %v203_v2, 0.0  ;;  %v211_v5 = vsel %vm207_vm0, %v204_v3, 0.0  ;;  %2286 = vrcp.f32 %v2598_v6  ;;  %s3247_s1 = sld [smem:[#allocation27_spill]]  ;;  %v2264_v44 = vld [vmem:[#allocation6] ss:$0 sm:$0xff]  ;;  %s2599_s27 = smov 96  }
  0x37   :  { %209 = vadd.xlane.f32.xlu0 %v208_v4  ;;  %v2265_v49 = vld [vmem:[#allocation8] ss:$0 sm:$0xff]  ;;  %s3248_s2 = sld [smem:[#allocation28_spill]]  ;;  %s2600_s6 = smov 88   ;;  %vm323_vm8 = vcmask 64512   ;;  %vm396_vm9 = vcmask 1043456  }
  0x38   :  { %s2601_s29 = smov 120   ;;  %s2602_s7 = smov 56  }
  0x39   :  { %s3249_s22 = sld [smem:[#allocation23_spill]]  ;;  %s2603_s3 = smov 80  }
  0x3a   :  { %s2604_s14 = smov 112   ;;  %s2605_s12 = smov 48  }
  0x3b   :  { %s2606_s25 = smov 72   ;;  %s3250_s17 = sld [smem:[#allocation29_spill]] }
  0x3c   :  { %v2287_v7 = vpop.eup %2286  ;;  %v2220_v23 = vld [vmem:[%s3247_s1 + $0x8] sm:$0xff]  ;;  %v2219_v25 = vld [vmem:[%s3247_s1] sm:$0xff]  ;;  %s2607_s4 = smov 104   ;;  %s3233_s28 = smov 40  }
  0x3d   :  { %v215_v8 = vmul.f32 32.0, %v2287_v7  ;;  %vm219_vm1 = vweird.f32 %v2287_v7  ;;  %304 = vmatpush.bf16.msra.mxu0 %v2220_v23  ;;  %v2266_v54 = vld [vmem:[%s3248_s2] ss:$0 sm:$0xff]  ;;  %s3251_s5 = sld [smem:[#allocation30_spill]] }
  0x3f   :  { %212 = vadd.xlane.f32.xlu0 %v211_v5  ;;  %v216_v9 = vsub.f32 1.0, %v215_v8 }
  0x41   :  { %v217_v10 = vmul.f32 %v2287_v7, %v216_v9  ;;  %305 = vmatpush.bf16.msra.mxu0 %v2219_v25 }
  0x43   :  { %v218_v11 = vadd.f32 %v2287_v7, %v217_v10 }
  0x45   :  { %v2780_v12 = vsel %vm219_vm1, %v2287_v7, %v218_v11  ;;  %vm1022_vm1 = vcmask 523264  }
  0xaa   :  { %v210_v13 = vpop.xlane.xlu0 %209 }
  0xab   :  { %v221_v14 = vmul.f32 %v2780_v12, %v210_v13 }
  0xad   :  { %v223_v15 = vsub.f32 %v203_v2, %v221_v14  ;;  %v269_v14 = vld [vmem:[%s3249_s22] sm:$0x3] }
  0xaf   :  { %v225_v16 = vmul.f32 %v223_v15, %v223_v15 }
  0xb1   :  { %v227_v17 = vsel %vm207_vm0, %v225_v16, 0.0 }
  0xb2   :  { %228 = vadd.xlane.f32.xlu1 %v227_v17  ;;  %v213_v18 = vpop.xlane.xlu0 %212 }
  0xb3   :  { %v222_v19 = vmul.f32 %v2780_v12, %v213_v18 }
  0xb5   :  { %v224_v20 = vsub.f32 %v204_v3, %v222_v19 }
  0xb7   :  { %v226_v21 = vmul.f32 %v224_v20, %v224_v20 }
  0xb9   :  { %v230_v22 = vsel %vm207_vm0, %v226_v21, 0.0 }
  0xba   :  { %231 = vadd.xlane.f32.xlu1 %v230_v22 }
 0x125   :  { %v229_v24 = vpop.xlane.xlu1 %228 }
 0x126   :  { %v233_v26 = vmul.f32 %v229_v24, %v2780_v12 }
 0x128   :  { %v235_v27 = vadd.f32 1e-05, %v233_v26 }
 0x12a   :  { %2288 = vrsqrt.f32 %v235_v27  ;;  %vm243_vm3 = vweird.f32 %v235_v27 }
 0x12d   :  { %v232_v28 = vpop.xlane.xlu1 %231 }
 0x12e   :  { %v234_v29 = vmul.f32 %v232_v28, %v2780_v12 }
 0x130   :  { %v2289_v30 = vpop.eup %2288  ;;  %v236_v31 = vadd.f32 1e-05, %v234_v29 }
 0x131   :  { %v238_v32 = vmul.f32 %v2289_v30, %v235_v27  ;;  %vm244_vm2 = vweird.f32 %v2289_v30 }
 0x132   :  { %2290 = vrsqrt.f32 %v236_v31  ;;  %vm245_vm4 = vmor %vm243_vm3, %vm244_vm2  ;;  %vm253_vm6 = vweird.f32 %v236_v31 }
 0x133   :  { %v239_v33 = vmul.f32 %v2289_v30, %v238_v32 }
 0x135   :  { %v240_v34 = vmul.f32 0.5, %v239_v33 }
 0x137   :  { %v241_v35 = vsub.f32 1.5, %v240_v34 }
 0x138   :  { %v2291_v36 = vpop.eup %2290 }
 0x139   :  { %v242_v37 = vmul.f32 %v2289_v30, %v241_v35  ;;  %v248_v38 = vmul.f32 %v2291_v36, %v236_v31  ;;  %vm254_vm5 = vweird.f32 %v2291_v36 }
 0x13a   :  { %vm255_vm7 = vmor %vm253_vm6, %vm254_vm5 }
 0x13b   :  { %v249_v39 = vmul.f32 %v2291_v36, %v248_v38  ;;  %v246_v40 = vsel %vm245_vm4, %v2289_v30, %v242_v37 }
 0x13c   :  { %v257_v43 = vmul.f32 %v246_v40, %v223_v15  ;;  %v270_v15 = vsub.f32 1.0, %v269_v14 }
 0x13d   :  { %v250_v41 = vmul.f32 0.5, %v249_v39 }
 0x13e   :  { %v262_v48 = vmul.f32 %v2264_v44, %v257_v43  ;;  %v271_v16 = vmul.f32 -1e+09, %v270_v15 }
 0x13f   :  { %v251_v42 = vsub.f32 1.5, %v250_v41 }
 0x140   :  { %v2794_v51 = vadd.f32 %v2265_v49, %v262_v48  ;;  %v2834_v17 = vperm.slane %v271_v16, 0  ;;  %v273_v25 = vrot.slane %v271_v16, 1 }
 0x141   :  { %v252_v45 = vmul.f32 %v2291_v36, %v251_v42 }
 0x142   :  { %v2842_v27 = vperm.slane %v273_v25, 0 }
 0x143   :  { %v256_v46 = vsel %vm255_vm7, %v2291_v36, %v252_v45 }
 0x144   :  { %v258_v47 = vmul.f32 %v256_v46, %v224_v20 }
 0x146   :  { %v263_v50 = vmul.f32 %v2264_v44, %v258_v47 }
 0x148   :  { %v2796_v52 = vadd.f32 %v2265_v49, %v263_v50 }
 0x14a   :  { %v274_v53 = vpack.c.bf16 %v2796_v52, %v2794_v51 }
 0x14c   :  { %2070 = vmatmul.msk.bf16.vlgmr.msra.gmra.mxu0 %vm207_vm0, %v274_v53 }
 0x1c9   :  { %v307_v55 = vpop.f32.mrf.mxu0 }
 0x1ca   :  { %v308_v56 = vadd.f32 %v2266_v54, %v307_v55 }
 0x1cc   :  { %v312_v57 = vpack.c.bf16 %v308_v56, %v308_v56 }
 0x1ce   :  { %v319_v58 = vunpack.c.l.b16 %v312_v57 }
 0x1d0   :  { %v2804_v59 = vpack.c.b16 %v319_v58, %v319_v58 }
 0x1d1   :  { %v309_v60 = vpop.f32.mrf.mxu0 }
 0x1d2   :  { %v310_v61 = vadd.f32 %v2266_v54, %v309_v60  ;;  %321 = vrot.lane.b32.xlu0 %v2804_v59, %s2599_s27  ;;  %438 = vrot.lane.b32.xlu2 %v2804_v59, %s2600_s6 }
 0x1d4   :  { %v313_v62 = vpack.c.bf16 %v310_v61, %v310_v61 }
 0x1d6   :  { %v344_v63 = vunpack.c.l.b16 %v313_v62 }
 0x1d8   :  { %v2810_v0 = vpack.c.b16 %v344_v63, %v344_v63 }
 0x1da   :  { %346 = vrot.lane.b32.xlu1 %v2810_v0, %s2599_s27  ;;  %436 = vrot.lane.b32.xlu2 %v2804_v59, %s2601_s29 }
 0x1e2   :  { %506 = vrot.lane.b32.xlu1 %v2804_v59, %s2602_s7  ;;  %461 = vrot.lane.b32.xlu2 %v2810_v0, %s2600_s6 }
 0x1ea   :  { %459 = vrot.lane.b32.xlu2 %v2810_v0, %s2601_s29 }
 0x22c   :  { %v439_v1 = vpop.permute.xlu2 %438 }
 0x22d   :  { %v444_v2 = vsel %vm323_vm8, %v439_v1, 0 }
 0x22e   :  { %453 = vmatpush.bf16.xpose.msrb.mxu0 %v444_v2 }
 0x234   :  { %v437_v3 = vpop.permute.xlu2 %436 }
 0x235   :  { %2075 = vmatmul.msk.bf16.vlgmr.msrb.gmra.mxu0 %vm323_vm8, %v437_v3 }
 0x23c   :  { %v462_v4 = vpop.permute.xlu2 %461 }
 0x23d   :  { %v467_v7 = vsel %vm323_vm8, %v462_v4, 0 }
 0x244   :  { %v322_v5 = vpop.permute.xlu0 %321  ;;  %v460_v13 = vpop.permute.xlu2 %459 }
 0x245   :  { %v328_v6 = vsel %vm323_vm8, %v322_v5, 0 }
 0x246   :  { %337 = vmatpush.bf16.xpose.msra.mxu1 %v328_v6 }
 0x24c   :  { %v347_v8 = vpop.permute.xlu1 %346 }
 0x24d   :  { %2071 = vmatmul.msk.bf16.vlgmr.msra.gmra.mxu1 %vm323_vm8, %v312_v57  ;;  %v352_v9 = vsel %vm323_vm8, %v347_v8, 0 }
 0x24e   :  { %476 = vmatpush.bf16.xpose.msrb.mxu1 %v467_v7  ;;  %361 = vmatpush.bf16.xpose.msra.mxu2 %v352_v9  ;;  %v2079_v7 = vld [vmem:[%s3250_s17 + $0x4] sm:$0xf] }
 0x24f   :  { %v555_v8 = vsel %vm396_vm9, %v2079_v7, 0 }
 0x250   :  { %564 = vmatpush.bf16.msra.mxu0 %v555_v8 }
 0x254   :  { %v507_v10 = vpop.permute.xlu1 %506 }
 0x255   :  { %2072 = vmatmul.msk.bf16.vlgmr.msra.gmra.mxu2 %vm323_vm8, %v313_v62  ;;  %v512_v11 = vsel %vm396_vm9, %v507_v10, 0 }
 0x256   :  { %521 = vmatpush.bf16.msrb.mxu2 %v512_v11 }
 0x25d   :  { %2076 = vmatmul.msk.bf16.vlgmr.msrb.gmra.mxu1 %vm323_vm8, %v460_v13 }
 0x2b2   :  { %v455_v18 = vpop.f32.mrf.mxu0 }
 0x2b3   :  { %v456_v19 = vadd.f32 %v455_v18, %v2834_v17 }
 0x2b5   :  { %v482_v20 = vsel %vm323_vm8, %v456_v19, -inf }
 0x2b6   :  { %483 = vmax.xlane.f32.xlu2 %v482_v20 }
 0x2ba   :  { %v457_v21 = vpop.f32.mrf.mxu0 }
 0x2ca   :  { %v339_v22 = vpop.f32.mrf.mxu1 }
 0x2cb   :  { %v340_v23 = vadd.f32 %v339_v22, %v2834_v17 }
 0x2cd   :  { %v367_v24 = vsel %vm323_vm8, %v340_v23, -inf }
 0x2ce   :  { %368 = vmax.xlane.f32.xlu1 %v367_v24  ;;  %593 = vrot.lane.b32.xlu2 %v2804_v59, %s2603_s3 }
 0x2d2   :  { %v341_v26 = vpop.f32.mrf.mxu1 }
 0x2d8   :  { %v363_v28 = vpop.f32.mrf.mxu2 }
 0x2d9   :  { %v364_v29 = vadd.f32 %v363_v28, %v2842_v27 }
 0x2da   :  { %v478_v30 = vpop.f32.mrf.mxu1 }
 0x2db   :  { %v370_v31 = vsel %vm323_vm8, %v364_v29, -inf  ;;  %v479_v34 = vadd.f32 %v478_v30, %v2842_v27 }
 0x2dc   :  { %371 = vmax.xlane.f32.xlu1 %v370_v31 }
 0x2dd   :  { %v485_v35 = vsel %vm323_vm8, %v479_v34, -inf }
 0x2e0   :  { %v365_v32 = vpop.f32.mrf.mxu2 }
 0x2e2   :  { %v480_v33 = vpop.f32.mrf.mxu1 }
 0x2f5   :  { %391 = vrot.lane.b32.xlu1 %v2804_v59, %s2596_s23 }
 0x2f7   :  { %486 = vmax.xlane.f32.xlu2 %v485_v35 }
 0x30f   :  { %413 = vrot.lane.b32.xlu2 %v2810_v0, %s2596_s23 }
 0x317   :  { %616 = vrot.lane.b32.xlu2 %v2810_v0, %s2603_s3 }
 0x329   :  { %v484_v36 = vpop.xlane.xlu2 %483 }
 0x32a   :  { %v488_v37 = vsub.f32 %v456_v19, %v484_v36 }
 0x32c   :  { %v490_v38 = vmul.f32 1.442695, %v488_v37 }
 0x32e   :  { %2292 = vpow2.f32 %v490_v38 }
 0x331   :  { %v594_v39 = vpop.permute.xlu2 %593 }
 0x332   :  { %v599_v40 = vsel %vm323_vm8, %v594_v39, 0  ;;  %v435_v39 = vld [vmem:[%s3250_s17] sm:$0xf] }
 0x333   :  { %608 = vmatpush.bf16.xpose.msra.mxu2 %v599_v40  ;;  %v575_v40 = vsel %vm396_vm9, %v435_v39, 0  ;;  %v2086_v39 = vld [vmem:[%s3250_s17 + $0x8] sm:$0xf] }
 0x334   :  { %v2293_v41 = vpop.eup %2292  ;;  %584 = vmatpush.bf16.msra.mxu1 %v575_v40  ;;  %v710_v40 = vsel %vm396_vm9, %v2086_v39, 0 }
 0x335   :  { %v494_v42 = vsel %vm323_vm8, %v2293_v41, 0.0 }
 0x336   :  { %495 = vadd.xlane.f32.xlu0 %v494_v42 }
 0x341   :  { %v369_v43 = vpop.xlane.xlu1 %368 }
 0x342   :  { %v373_v49 = vsub.f32 %v340_v23, %v369_v43 }
 0x344   :  { %v375_v50 = vmul.f32 1.442695, %v373_v49 }
 0x34a   :  { %591 = vrot.lane.b32.xlu0 %v2804_v59, %s2604_s14 }
 0x34f   :  { %v372_v44 = vpop.xlane.xlu1 %371 }
 0x350   :  { %v374_v45 = vsub.f32 %v364_v29, %v372_v44 }
 0x352   :  { %v377_v46 = vmul.f32 1.442695, %v374_v45 }
 0x354   :  { %2294 = vpow2.f32 %v377_v46 }
 0x355   :  { %2296 = vpow2.f32 %v375_v50 }
 0x35a   :  { %v2295_v47 = vpop.eup %2294 }
 0x35b   :  { %v382_v48 = vsel %vm323_vm8, %v2295_v47, 0.0  ;;  %v2297_v58 = vpop.eup %2296 }
 0x35c   :  { %383 = vadd.xlane.f32.xlu1 %v382_v48  ;;  %v379_v61 = vsel %vm323_vm8, %v2297_v58, 0.0 }
 0x367   :  { %v392_v53 = vpop.permute.xlu1 %391 }
 0x368   :  { %v398_v54 = vsel %vm396_vm9, %v392_v53, 0 }
 0x369   :  { %407 = vmatpush.bf16.msra.mxu3 %v398_v54 }
 0x36a   :  { %v487_v55 = vpop.xlane.xlu2 %486 }
 0x36b   :  { %v489_v56 = vsub.f32 %v479_v34, %v487_v55 }
 0x36d   :  { %v492_v57 = vmul.f32 1.442695, %v489_v56 }
 0x36f   :  { %2298 = vpow2.f32 %v492_v57 }
 0x372   :  { %v414_v60 = vpop.permute.xlu2 %413 }
 0x373   :  { %v419_v62 = vsel %vm396_vm9, %v414_v60, 0 }
 0x374   :  { %380 = vadd.xlane.f32.xlu0 %v379_v61  ;;  %428 = vmatpush.bf16.msrb.mxu3 %v419_v62 }
 0x375   :  { %614 = vrot.lane.b32.xlu1 %v2810_v0, %s2604_s14  ;;  %v2299_v63 = vpop.eup %2298 }
 0x376   :  { %v497_v1 = vsel %vm323_vm8, %v2299_v63, 0.0 }
 0x37a   :  { %v617_v22 = vpop.permute.xlu2 %616 }
 0x37b   :  { %v622_v26 = vsel %vm323_vm8, %v617_v22, 0 }
 0x37c   :  { %498 = vadd.xlane.f32.xlu0 %v497_v1 }
 0x37d   :  { %661 = vrot.lane.b32.xlu1 %v2804_v59, %s2605_s12 }
 0x385   :  { %730 = vrot.lane.b32.xlu1 %v2804_v59, %s2606_s25 }
 0x38d   :  { %753 = vrot.lane.b32.xlu1 %v2810_v0, %s2606_s25 }
 0x390   :  { %527 = vrot.lane.b32.xlu0 %v2810_v0, %s2602_s7 }
 0x3a9   :  { %v496_v2 = vpop.xlane.xlu0 %495 }
 0x3aa   :  { %2300 = vrcp.f32 %v496_v2 }
 0x3b0   :  { %v2301_v3 = vpop.eup %2300 }
 0x3b1   :  { %v502_v4 = vmul.f32 %v2301_v3, %v2293_v41 }
 0x3b3   :  { %v504_v5 = vpack.c.bf16 %v502_v4, %v502_v4 }
 0x3b5   :  { %2077 = vmatmul.msk.bf16.vlgmr.msrb.gmra.mxu2 %vm323_vm8, %v504_v5 }
 0x3b6   :  { %719 = vmatpush.bf16.msrb.mxu2 %v710_v40 }
 0x3bc   :  { %v592_v6 = vpop.permute.xlu0 %591 }
 0x3c5   :  { %2082 = vmatmul.msk.bf16.vlgmr.msra.gmra.mxu2 %vm323_vm8, %v592_v6 }
 0x3cf   :  { %v384_v9 = vpop.xlane.xlu1 %383 }
 0x3e7   :  { %v615_v10 = vpop.permute.xlu1 %614  ;;  %v381_v11 = vpop.xlane.xlu0 %380 }
 0x3e8   :  { %2302 = vrcp.f32 %v381_v11 }
 0x3e9   :  { %2304 = vrcp.f32 %v384_v9 }
 0x3ee   :  { %v2303_v13 = vpop.eup %2302 }
 0x3ef   :  { %v662_v14 = vpop.permute.xlu1 %661  ;;  %v387_v15 = vmul.f32 %v2303_v13, %v2297_v58  ;;  %v2305_v19 = vpop.eup %2304 }
 0x3f0   :  { %v667_v16 = vsel %vm396_vm9, %v662_v14, 0  ;;  %v499_v20 = vpop.xlane.xlu0 %498  ;;  %v388_v21 = vmul.f32 %v2305_v19, %v2295_v47 }
 0x3f1   :  { %676 = vmatpush.bf16.msrb.mxu0 %v667_v16  ;;  %v389_v18 = vpack.c.bf16 %v387_v15, %v387_v15  ;;  %2306 = vrcp.f32 %v499_v20 }
 0x3f2   :  { %v390_v23 = vpack.c.bf16 %v388_v21, %v388_v21 }
 0x3f3   :  { %2073 = vmatmul.msk.bf16.vlgmr.msra.gmra.mxu3 %vm323_vm8, %v389_v18 }
 0x3f7   :  { %v2307_v28 = vpop.eup %2306  ;;  %v731_v30 = vpop.permute.xlu1 %730 }
 0x3f8   :  { %v503_v29 = vmul.f32 %v2307_v28, %v2299_v63  ;;  %v736_v32 = vsel %vm323_vm8, %v731_v30, 0 }
 0x3fa   :  { %v505_v31 = vpack.c.bf16 %v503_v29, %v503_v29 }
 0x3ff   :  { %v754_v46 = vpop.permute.xlu1 %753 }
 0x400   :  { %v759_v49 = vsel %vm323_vm8, %v754_v46, 0 }
 0x402   :  { %v528_v24 = vpop.permute.xlu0 %527 }
 0x403   :  { %v533_v25 = vsel %vm396_vm9, %v528_v24, 0  ;;  %2074 = vmatmul.msk.bf16.vlgmr.msrb.gmra.mxu3 %vm323_vm8, %v390_v23 }
 0x404   :  { %542 = vmatpush.bf16.msra.mxu3 %v533_v25 }
 0x408   :  { %631 = vmatpush.bf16.xpose.msrb.mxu3 %v622_v26 }
 0x413   :  { %2078 = vmatmul.msk.bf16.vlgmr.msra.gmra.mxu3 %vm323_vm8, %v505_v31 }
 0x414   :  { %745 = vmatpush.bf16.xpose.msra.mxu3 %v736_v32 }
 0x423   :  { %2083 = vmatmul.msk.bf16.vlgmr.msrb.gmra.mxu3 %vm323_vm8, %v615_v10 }
 0x438   :  { %v523_v33 = vpop.f32.mrf.mxu2 }
 0x440   :  { %v525_v34 = vpop.f32.mrf.mxu2 }
 0x448   :  { %v610_v35 = vpop.f32.mrf.mxu2 }
 0x449   :  { %v611_v36 = vadd.f32 %v610_v35, %v2834_v17 }
 0x44b   :  { %v637_v37 = vsel %vm323_vm8, %v611_v36, -inf }
 0x44c   :  { %638 = vmax.xlane.f32.xlu0 %v637_v37 }
 0x450   :  { %v612_v38 = vpop.f32.mrf.mxu2 }
 0x460   :  { %728 = vrot.lane.b32.xlu0 %v2804_v59, %s2607_s4 }
 0x476   :  { %v409_v41 = vpop.f32.mrf.mxu3 }
 0x47e   :  { %v411_v42 = vpop.f32.mrf.mxu3 }
 0x486   :  { %v430_v43 = vpop.f32.mrf.mxu3 }
 0x487   :  { %v434_v44 = vpack.c.bf16 %v430_v43, %v409_v41 }
 0x489   :  { %2081 = vmatmul.msk.bf16.vlgmr.msra.gmra.mxu1 %vm323_vm8, %v434_v44 }
 0x48e   :  { %v432_v45 = vpop.f32.mrf.mxu3 }
 0x496   :  { %v544_v47 = vpop.f32.mrf.mxu3 }
 0x497   :  { %v548_v48 = vpack.c.bf16 %v544_v47, %v523_v33 }
 0x499   :  { %2080 = vmatmul.msk.bf16.vlgmr.msra.gmra.mxu0 %vm323_vm8, %v548_v48 }
 0x49a   :  { %768 = vmatpush.bf16.xpose.msra.mxu0 %v759_v49 }
 0x49e   :  { %v546_v50 = vpop.f32.mrf.mxu3 }
 0x4a6   :  { %v633_v53 = vpop.f32.mrf.mxu3 }
 0x4a7   :  { %v634_v54 = vadd.f32 %v633_v53, %v2842_v27 }
 0x4a9   :  { %v640_v55 = vsel %vm323_vm8, %v634_v54, -inf }
 0x4aa   :  { %641 = vmax.xlane.f32.xlu1 %v640_v55 }
 0x4ae   :  { %v635_v56 = vpop.f32.mrf.mxu3 }
 0x4bf   :  { %v639_v57 = vpop.xlane.xlu0 %638 }
 0x4c0   :  { %v643_v58 = vsub.f32 %v611_v36, %v639_v57 }
 0x4c2   :  { %v645_v60 = vmul.f32 1.442695, %v643_v58 }
 0x4c4   :  { %2308 = vpow2.f32 %v645_v60 }
 0x4ca   :  { %v2309_v61 = vpop.eup %2308 }
 0x4cb   :  { %v649_v62 = vsel %vm323_vm8, %v2309_v61, 0.0 }
 0x4cc   :  { %650 = vadd.xlane.f32.xlu2 %v649_v62 }
 0x4d2   :  { %v729_v63 = vpop.permute.xlu0 %728 }
 0x4d3   :  { %2088 = vmatmul.msk.bf16.vlgmr.msra.gmra.mxu3 %vm323_vm8, %v729_v63 }
 0x4e4   :  { %751 = vrot.lane.b32.xlu2 %v2810_v0, %s2607_s4 }
 0x4ec   :  { %682 = vrot.lane.b32.xlu2 %v2810_v0, %s2605_s12 }
 0x506   :  { %v586_v1 = vpop.f32.mrf.mxu1 }
 0x50e   :  { %v588_v41 = vpop.f32.mrf.mxu1 }
 0x516   :  { %v566_v2 = vpop.f32.mrf.mxu0 }
 0x517   :  { %v2906_v3 = vadd.f32 %v586_v1, %v566_v2 }
 0x51d   :  { %v642_v4 = vpop.xlane.xlu1 %641 }
 0x51e   :  { %v644_v5 = vsub.f32 %v634_v54, %v642_v4  ;;  %v2915_v26 = vpop.f32.mrf.mxu0 }
 0x520   :  { %v647_v6 = vmul.f32 1.442695, %v644_v5 }
 0x522   :  { %2310 = vpow2.f32 %v647_v6 }
 0x528   :  { %v2311_v7 = vpop.eup %2310 }
 0x529   :  { %v652_v8 = vsel %vm323_vm8, %v2311_v7, 0.0 }
 0x52a   :  { %653 = vadd.xlane.f32.xlu0 %v652_v8 }
 0x53f   :  { %v651_v9 = vpop.xlane.xlu2 %650 }
 0x540   :  { %2312 = vrcp.f32 %v651_v9 }
 0x546   :  { %v2313_v10 = vpop.eup %2312 }
 0x547   :  { %v657_v11 = vmul.f32 %v2313_v10, %v2309_v61  ;;  %v752_v13 = vpop.permute.xlu2 %751  ;;  %v2267_v10 = vld [vmem:[%s3251_s5] ss:$0 sm:$0xff] }
 0x549   :  { %v659_v14 = vpack.c.bf16 %v657_v11, %v657_v11 }
 0x54b   :  { %2084 = vmatmul.msk.bf16.vlgmr.msrb.gmra.mxu0 %vm323_vm8, %v659_v14 }
 0x54f   :  { %v683_v15 = vpop.permute.xlu2 %682 }
 0x550   :  { %v688_v16 = vsel %vm396_vm9, %v683_v15, 0  ;;  %v589_v15 = vadd.f32 %v588_v41, %v2915_v26 }
 0x551   :  { %697 = vmatpush.bf16.msrb.mxu1 %v688_v16 }
 0x556   :  { %v747_v18 = vpop.f32.mrf.mxu3 }
 0x557   :  { %v748_v19 = vadd.f32 %v747_v18, %v2834_v17 }
 0x559   :  { %v774_v20 = vsel %vm323_vm8, %v748_v19, -inf }
 0x55a   :  { %775 = vmax.xlane.f32.xlu1 %v774_v20 }
 0x55b   :  { %2089 = vmatmul.msk.bf16.vlgmr.msra.gmra.mxu0 %vm323_vm8, %v752_v13 }
 0x55e   :  { %v749_v21 = vpop.f32.mrf.mxu3 }
 0x59d   :  { %v654_v22 = vpop.xlane.xlu0 %653 }
 0x59e   :  { %2314 = vrcp.f32 %v654_v22 }
 0x5a4   :  { %v2315_v23 = vpop.eup %2314 }
 0x5a5   :  { %v658_v24 = vmul.f32 %v2315_v23, %v2311_v7 }
 0x5a7   :  { %v660_v25 = vpack.c.bf16 %v658_v24, %v658_v24 }
 0x5a9   :  { %2085 = vmatmul.msk.bf16.vlgmr.msrb.gmra.mxu1 %vm323_vm8, %v660_v25 }
 0x5c8   :  { %v678_v28 = vpop.f32.mrf.mxu0 }
 0x5cd   :  { %v776_v29 = vpop.xlane.xlu1 %775 }
 0x5ce   :  { %v780_v30 = vsub.f32 %v748_v19, %v776_v29 }
 0x5d0   :  { %v782_v31 = vmul.f32 1.442695, %v780_v30  ;;  %v680_v32 = vpop.f32.mrf.mxu0 }
 0x5d2   :  { %2316 = vpow2.f32 %v782_v31 }
 0x5d8   :  { %v2317_v33 = vpop.eup %2316  ;;  %v770_v34 = vpop.f32.mrf.mxu0 }
 0x5d9   :  { %v771_v35 = vadd.f32 %v770_v34, %v2842_v27  ;;  %v786_v36 = vsel %vm323_vm8, %v2317_v33, 0.0 }
 0x5da   :  { %787 = vadd.xlane.f32.xlu0 %v786_v36 }
 0x5db   :  { %v777_v37 = vsel %vm323_vm8, %v771_v35, -inf }
 0x5dc   :  { %778 = vmax.xlane.f32.xlu2 %v777_v37 }
 0x5e0   :  { %v772_v38 = vpop.f32.mrf.mxu0 }
 0x5e1   :  { %v2221_v38 = vld [vmem:[%s3215_s11] sm:$0xff] }
 0x5ee   :  { %798 = vrot.lane.b32.xlu0 %v2804_v59, %s3233_s28 }
 0x626   :  { %v699_v42 = vpop.f32.mrf.mxu1 }
 0x627   :  { %v703_v43 = vpack.c.bf16 %v699_v42, %v678_v28 }
 0x629   :  { %2087 = vmatmul.msk.bf16.vlgmr.msrb.gmra.mxu2 %vm323_vm8, %v703_v43 }
 0x62e   :  { %v701_v44 = vpop.f32.mrf.mxu1 }
 0x64d   :  { %v788_v48 = vpop.xlane.xlu0 %787 }
 0x64f   :  { %v779_v45 = vpop.xlane.xlu2 %778 }
 0x650   :  { %v781_v46 = vsub.f32 %v771_v35, %v779_v45 }
 0x652   :  { %v784_v47 = vmul.f32 1.442695, %v781_v46 }
 0x654   :  { %2318 = vpow2.f32 %v784_v47 }
 0x655   :  { %2320 = vrcp.f32 %v788_v48 }
 0x65a   :  { %v2319_v59 = vpop.eup %2318 }
 0x65b   :  { %v789_v49 = vsel %vm323_vm8, %v2319_v59, 0.0  ;;  %v2321_v50 = vpop.eup %2320 }
 0x65c   :  { %790 = vadd.xlane.f32.xlu1 %v789_v49  ;;  %v794_v53 = vmul.f32 %v2321_v50, %v2317_v33 }
 0x65e   :  { %v796_v56 = vpack.c.bf16 %v794_v53, %v794_v53 }
 0x660   :  { %v799_v54 = vpop.permute.xlu0 %798 }
 0x661   :  { %v804_v55 = vsel %vm396_vm9, %v799_v54, 0 }
 0x662   :  { %813 = vmatpush.bf16.msra.mxu1 %v804_v55  ;;  %v2268_v55 = vld [vmem:[%s3213_s9] ss:$0 sm:$0xff] }
 0x665   :  { %2090 = vmatmul.msk.bf16.vlgmr.msra.gmra.mxu1 %vm323_vm8, %v796_v56 }
 0x675   :  { %819 = vrot.lane.b32.xlu1 %v2810_v0, %s3233_s28  ;;  %v2092_v0 = vld [vmem:[%s3250_s17 + $0xc] sm:$0xf] }
 0x676   :  { %v847_v6 = vsel %vm396_vm9, %v2092_v0, 0  ;;  %v2225_v0 = vld [vmem:[%s3217_s13 + $0x10] sm:$0xff] }
 0x677   :  { %856 = vmatpush.bf16.msrb.mxu3 %v847_v6  ;;  %v2224_v6 = vld [vmem:[%s3217_s13 + $0x8] sm:$0xff] }
 0x6ac   :  { %v721_v57 = vpop.f32.mrf.mxu2 }
 0x6ad   :  { %v726_v58 = vadd.f32 %v721_v57, %v2906_v3 }
 0x6b4   :  { %v723_v3 = vpop.f32.mrf.mxu2 }
 0x6b5   :  { %v727_v18 = vadd.f32 %v723_v3, %v589_v15  ;;  %v2270_v3 = vld [vmem:[#allocation11] ss:$0 sm:$0xff] }
 0x6cf   :  { %v791_v60 = vpop.xlane.xlu1 %790 }
 0x6d0   :  { %2322 = vrcp.f32 %v791_v60  ;;  %v2269_v60 = vld [vmem:[#allocation9] ss:$0 sm:$0xff] }
 0x6d6   :  { %v2323_v62 = vpop.eup %2322 }
 0x6d7   :  { %v795_v63 = vmul.f32 %v2323_v62, %v2319_v59 }
 0x6d9   :  { %v797_v4 = vpack.c.bf16 %v795_v63, %v795_v63 }
 0x6e2   :  { %v815_v61 = vpop.f32.mrf.mxu1 }
 0x6e7   :  { %v820_v1 = vpop.permute.xlu1 %819 }
 0x6e8   :  { %v825_v2 = vsel %vm396_vm9, %v820_v1, 0 }
 0x6e9   :  { %834 = vmatpush.bf16.msra.mxu2 %v825_v2 }
 0x6ea   :  { %v817_v5 = vpop.f32.mrf.mxu1 }
 0x6eb   :  { %v2226_v5 = vld [vmem:[%s3217_s13 + $0x18] sm:$0xff] }
 0x6ec   :  { %2091 = vmatmul.msk.bf16.vlgmr.msra.gmra.mxu2 %vm323_vm8, %v797_v4  ;;  %1030 = vmatpush.bf16.msrb.mxu1 %v2226_v5 }
 0x6f0   :  { %1031 = vmatpush.bf16.msrb.mxu1 %v2225_v0 }
 0x6f4   :  { %1032 = vmatpush.bf16.msrb.mxu1 %v2224_v6 }
 0x76f   :  { %v836_v7 = vpop.f32.mrf.mxu2 }
 0x770   :  { %v840_v8 = vpack.c.bf16 %v836_v7, %v815_v61 }
 0x772   :  { %2093 = vmatmul.msk.bf16.vlgmr.msrb.gmra.mxu3 %vm323_vm8, %v840_v8  ;;  %v2223_v8 = vld [vmem:[%s3217_s13] sm:$0xff] }
 0x773   :  { %1033 = vmatpush.bf16.msrb.mxu1 %v2223_v8 }
 0x777   :  { %v838_v9 = vpop.f32.mrf.mxu2 }
 0x7f5   :  { %v858_v11 = vpop.f32.mrf.mxu3 }
 0x7f6   :  { %v863_v13 = vadd.f32 %v858_v11, %v726_v58 }
 0x7f8   :  { %v869_v14 = vadd.f32 %v2267_v10, %v863_v13 }
 0x7fa   :  { %v871_v16 = vadd.f32 %v869_v14, %v2794_v51 }
 0x7fc   :  { %v875_v19 = vsel %vm207_vm0, %v871_v16, 0.0 }
 0x7fd   :  { %876 = vadd.xlane.f32.xlu2 %v875_v19  ;;  %v860_v20 = vpop.f32.mrf.mxu3 }
 0x7fe   :  { %v864_v21 = vadd.f32 %v860_v20, %v727_v18 }
 0x800   :  { %v870_v22 = vadd.f32 %v2267_v10, %v864_v21 }
 0x802   :  { %v872_v23 = vadd.f32 %v870_v22, %v2796_v52  ;;  %v2222_v52 = vld [vmem:[%s3215_s11 + $0x8] sm:$0xff] }
 0x803   :  { %959 = vmatpush.bf16.msrb.mxu0 %v2222_v52 }
 0x804   :  { %v878_v24 = vsel %vm207_vm0, %v872_v23, 0.0 }
 0x805   :  { %879 = vadd.xlane.f32.xlu2 %v878_v24 }
 0x807   :  { %960 = vmatpush.bf16.msrb.mxu0 %v2221_v38 }
 0x870   :  { %v877_v25 = vpop.xlane.xlu2 %876 }
 0x871   :  { %v881_v28 = vmul.f32 %v877_v25, %v2780_v12 }
 0x873   :  { %v883_v29 = vsub.f32 %v871_v16, %v881_v28 }
 0x875   :  { %v885_v30 = vmul.f32 %v883_v29, %v883_v29 }
 0x877   :  { %v887_v26 = vsel %vm207_vm0, %v885_v30, 0.0 }
 0x878   :  { %888 = vadd.xlane.f32.xlu1 %v887_v26  ;;  %v880_v51 = vpop.xlane.xlu2 %879 }
 0x879   :  { %v882_v31 = vmul.f32 %v880_v51, %v2780_v12 }
 0x87b   :  { %v884_v32 = vsub.f32 %v872_v23, %v882_v31 }
 0x87d   :  { %v886_v33 = vmul.f32 %v884_v32, %v884_v32 }
 0x87f   :  { %v890_v34 = vsel %vm207_vm0, %v886_v33, 0.0  ;;  %v2271_v33 = vld [vmem:[#allocation12] ss:$0 sm:$0xff] }
 0x880   :  { %891 = vadd.xlane.f32.xlu0 %v890_v34 }
 0x8eb   :  { %v889_v35 = vpop.xlane.xlu1 %888 }
 0x8ec   :  { %v893_v36 = vmul.f32 %v889_v35, %v2780_v12 }
 0x8ee   :  { %v895_v37 = vadd.f32 1e-05, %v893_v36 }
 0x8f0   :  { %2324 = vrsqrt.f32 %v895_v37  ;;  %vm903_vm11 = vweird.f32 %v895_v37 }
 0x8f3   :  { %v892_v39 = vpop.xlane.xlu0 %891 }
 0x8f4   :  { %v894_v40 = vmul.f32 %v892_v39, %v2780_v12 }
 0x8f6   :  { %v2325_v41 = vpop.eup %2324  ;;  %v896_v42 = vadd.f32 1e-05, %v894_v40 }
 0x8f7   :  { %v898_v43 = vmul.f32 %v2325_v41, %v895_v37  ;;  %vm904_vm10 = vweird.f32 %v2325_v41 }
 0x8f8   :  { %2326 = vrsqrt.f32 %v896_v42  ;;  %vm905_vm12 = vmor %vm903_vm11, %vm904_vm10  ;;  %vm913_vm14 = vweird.f32 %v896_v42 }
 0x8f9   :  { %v899_v44 = vmul.f32 %v2325_v41, %v898_v43 }
 0x8fb   :  { %v900_v45 = vmul.f32 0.5, %v899_v44 }
 0x8fd   :  { %v901_v46 = vsub.f32 1.5, %v900_v45 }
 0x8fe   :  { %v2327_v47 = vpop.eup %2326 }
 0x8ff   :  { %v902_v48 = vmul.f32 %v2325_v41, %v901_v46  ;;  %v908_v59 = vmul.f32 %v2327_v47, %v896_v42  ;;  %vm914_vm13 = vweird.f32 %v2327_v47 }
 0x900   :  { %vm915_vm15 = vmor %vm913_vm14, %vm914_vm13 }
 0x901   :  { %v909_v49 = vmul.f32 %v2327_v47, %v908_v59  ;;  %v906_v50 = vsel %vm905_vm12, %v2325_v41, %v902_v48 }
 0x902   :  { %v917_v56 = vmul.f32 %v906_v50, %v883_v29  ;;  %v2228_v50 = vld [vmem:[%s3247_s1 + $0x18] sm:$0xff] }
 0x903   :  { %v910_v53 = vmul.f32 0.5, %v909_v49  ;;  %1130 = vmatpush.bf16.msrb.mxu2 %v2228_v50 }
 0x904   :  { %v922_v61 = vmul.f32 %v2268_v55, %v917_v56  ;;  %v2227_v56 = vld [vmem:[%s3247_s1 + $0x10] sm:$0xff] }
 0x905   :  { %v911_v54 = vsub.f32 1.5, %v910_v53 }
 0x906   :  { %v927_v1 = vadd.f32 %v2269_v60, %v922_v61 }
 0x907   :  { %v912_v57 = vmul.f32 %v2327_v47, %v911_v54  ;;  %1131 = vmatpush.bf16.msrb.mxu2 %v2227_v56 }
 0x909   :  { %v916_v58 = vsel %vm915_vm15, %v2327_v47, %v912_v57 }
 0x90a   :  { %v918_v62 = vmul.f32 %v916_v58, %v884_v32 }
 0x90c   :  { %v923_v63 = vmul.f32 %v2268_v55, %v918_v62 }
 0x90e   :  { %v928_v2 = vadd.f32 %v2269_v60, %v923_v63 }
 0x910   :  { %v929_v4 = vpack.c.bf16 %v928_v2, %v927_v1 }
 0x912   :  { %2102 = vmatmul.msk.bf16.vlgmr.msrb.gmra.mxu0 %vm207_vm0, %v929_v4 }
 0x98f   :  { %v962_v7 = vpop.f32.mrf.mxu0 }
 0x990   :  { %v963_v9 = vadd.f32 %v2270_v3, %v962_v7 }
 0x992   :  { %v967_v10 = vmul.f32 %v963_v9, %v963_v9 }
 0x994   :  { %v969_v11 = vmul.f32 %v967_v10, %v963_v9 }
 0x996   :  { %v971_v13 = vmul.f32 0.044715, %v969_v11 }
 0x997   :  { %v964_v14 = vpop.f32.mrf.mxu0 }
 0x998   :  { %v973_v15 = vadd.f32 %v971_v13, %v963_v9  ;;  %v965_v16 = vadd.f32 %v2270_v3, %v964_v14  ;;  %v2273_v14 = vld [vmem:[%s3220_s16] ss:$0 sm:$0xff] }
 0x99a   :  { %v975_v18 = vmul.f32 0.7978846, %v973_v15  ;;  %v968_v19 = vmul.f32 %v965_v16, %v965_v16 }
 0x99c   :  { %v970_v20 = vmul.f32 %v968_v19, %v965_v16  ;;  %2328 = vtanh.f32 %v975_v18 }
 0x99e   :  { %v972_v21 = vmul.f32 0.044715, %v970_v20 }
 0x9a0   :  { %v974_v22 = vadd.f32 %v972_v21, %v965_v16 }
 0x9a2   :  { %v976_v23 = vmul.f32 0.7978846, %v974_v22  ;;  %v2329_v24 = vpop.eup %2328  ;;  %v2274_v22 = vld [vmem:[%s3248_s2 + $0x1] ss:$0 sm:$0xff] }
 0x9a3   :  { %v979_v25 = vadd.f32 1.0, %v2329_v24 }
 0x9a4   :  { %2330 = vtanh.f32 %v976_v23 }
 0x9a5   :  { %v981_v29 = vmul.f32 0.5, %v979_v25 }
 0x9a7   :  { %v983_v51 = vmul.f32 %v981_v29, %v963_v9  ;;  %v2272_v9 = vld [vmem:[#allocation14] ss:$0 sm:$0xff] }
 0x9aa   :  { %v2331_v28 = vpop.eup %2330 }
 0x9ab   :  { %v980_v30 = vadd.f32 1.0, %v2331_v28 }
 0x9ad   :  { %v982_v26 = vmul.f32 0.5, %v980_v30 }
 0x9af   :  { %v984_v31 = vmul.f32 %v982_v26, %v965_v16 }
 0x9b1   :  { %v985_v32 = vpack.c.bf16 %v984_v31, %v983_v51 }
 0x9b3   :  { %2119 = vmatmul.msk.bf16.vlgmr.msrb.gmra.mxu1 %vm1022_vm1, %v985_v32 }
 0xa30   :  { %v1035_v34 = vpop.f32.mrf.mxu1 }
 0xa31   :  { %v1036_v52 = vadd.f32 %v2271_v33, %v1035_v34 }
 0xa33   :  { %v1040_v35 = vadd.f32 %v1036_v52, %v927_v1 }
 0xa35   :  { %v1044_v36 = vsel %vm207_vm0, %v1040_v35, 0.0 }
 0xa36   :  { %1045 = vadd.xlane.f32.xlu2 %v1044_v36 }
 0xa38   :  { %v1037_v37 = vpop.f32.mrf.mxu1 }
 0xa39   :  { %v1038_v38 = vadd.f32 %v2271_v33, %v1037_v37 }
 0xa3b   :  { %v1041_v39 = vadd.f32 %v1038_v38, %v928_v2 }
 0xa3d   :  { %v1047_v40 = vsel %vm207_vm0, %v1041_v39, 0.0 }
 0xa3e   :  { %1048 = vadd.xlane.f32.xlu2 %v1047_v40 }
 0xaa9   :  { %v1046_v41 = vpop.xlane.xlu2 %1045 }
 0xaaa   :  { %v1050_v42 = vmul.f32 %v1046_v41, %v2780_v12 }
 0xaac   :  { %v1052_v43 = vsub.f32 %v1040_v35, %v1050_v42 }
 0xaae   :  { %v1054_v44 = vmul.f32 %v1052_v43, %v1052_v43 }
 0xab0   :  { %v1056_v45 = vsel %vm207_vm0, %v1054_v44, 0.0 }
 0xab1   :  { %1057 = vadd.xlane.f32.xlu2 %v1056_v45  ;;  %v1049_v46 = vpop.xlane.xlu2 %1048 }
 0xab2   :  { %v1051_v47 = vmul.f32 %v1049_v46, %v2780_v12 }
 0xab4   :  { %v1053_v48 = vsub.f32 %v1041_v39, %v1051_v47 }
 0xab6   :  { %v1055_v59 = vmul.f32 %v1053_v48, %v1053_v48 }
 0xab8   :  { %v1059_v49 = vsel %vm207_vm0, %v1055_v59, 0.0 }
 0xab9   :  { %1060 = vadd.xlane.f32.xlu2 %v1059_v49 }
 0xb24   :  { %v1058_v53 = vpop.xlane.xlu2 %1057 }
 0xb25   :  { %v1062_v54 = vmul.f32 %v1058_v53, %v2780_v12 }
 0xb27   :  { %v1064_v55 = vadd.f32 1e-05, %v1062_v54 }
 0xb29   :  { %2332 = vrsqrt.f32 %v1064_v55  ;;  %vm1072_vm3 = vweird.f32 %v1064_v55 }
 0xb2c   :  { %v1061_v57 = vpop.xlane.xlu2 %1060 }
 0xb2d   :  { %v1063_v58 = vmul.f32 %v1061_v57, %v2780_v12 }
 0xb2f   :  { %v2333_v60 = vpop.eup %2332  ;;  %v1065_v61 = vadd.f32 1e-05, %v1063_v58 }
 0xb30   :  { %v1067_v62 = vmul.f32 %v2333_v60, %v1064_v55  ;;  %vm1073_vm2 = vweird.f32 %v2333_v60 }
 0xb31   :  { %2334 = vrsqrt.f32 %v1065_v61  ;;  %vm1074_vm4 = vmor %vm1072_vm3, %vm1073_vm2  ;;  %vm1082_vm6 = vweird.f32 %v1065_v61 }
 0xb32   :  { %v1068_v63 = vmul.f32 %v2333_v60, %v1067_v62 }
 0xb34   :  { %v1069_v1 = vmul.f32 0.5, %v1068_v63 }
 0xb36   :  { %v1070_v2 = vsub.f32 1.5, %v1069_v1 }
 0xb37   :  { %v2335_v4 = vpop.eup %2334 }
 0xb38   :  { %v1071_v5 = vmul.f32 %v2333_v60, %v1070_v2  ;;  %v1077_v0 = vmul.f32 %v2335_v4, %v1065_v61  ;;  %vm1083_vm5 = vweird.f32 %v2335_v4 }
 0xb39   :  { %vm1084_vm7 = vmor %vm1082_vm6, %vm1083_vm5  ;;  %vm1942_vm5 = vcmask 1041409   ;;  %vm2022_vm6 = vcmask 1042432  }
 0xb3a   :  { %v1078_v6 = vmul.f32 %v2335_v4, %v1077_v0  ;;  %v1075_v3 = vsel %vm1074_vm4, %v2333_v60, %v1071_v5 }
 0xb3b   :  { %v1086_v10 = vmul.f32 %v1075_v3, %v1052_v43 }
 0xb3c   :  { %v1079_v7 = vmul.f32 0.5, %v1078_v6 }
 0xb3d   :  { %v1091_v15 = vmul.f32 %v2272_v9, %v1086_v10 }
 0xb3e   :  { %v1080_v8 = vsub.f32 1.5, %v1079_v7 }
 0xb3f   :  { %v2994_v19 = vadd.f32 %v2273_v14, %v1091_v15 }
 0xb40   :  { %v1081_v11 = vmul.f32 %v2335_v4, %v1080_v8 }
 0xb42   :  { %v1085_v13 = vsel %vm1084_vm7, %v2335_v4, %v1081_v11  ;;  %vm2018_vm7 = vcmask 23552  }
 0xb43   :  { %v1087_v16 = vmul.f32 %v1085_v13, %v1053_v48 }
 0xb45   :  { %v1092_v18 = vmul.f32 %v2272_v9, %v1087_v16 }
 0xb47   :  { %v2996_v20 = vadd.f32 %v2273_v14, %v1092_v18 }
 0xb49   :  { %v1098_v21 = vpack.c.bf16 %v2996_v20, %v2994_v19 }
 0xb4b   :  { %2133 = vmatmul.msk.bf16.vlgmr.msrb.gmra.mxu2 %vm207_vm0, %v1098_v21 }
 0xbce   :  { %v1133_v23 = vpop.f32.mrf.mxu2 }
 0xbcf   :  { %v1134_v24 = vadd.f32 %v2274_v22, %v1133_v23 }
 0xbd1   :  { %v1138_v25 = vpack.c.bf16 %v1134_v24, %v1134_v24 }
 0xbd3   :  { %v1141_v28 = vunpack.c.l.b16 %v1138_v25 }
 0xbd5   :  { %v3004_v29 = vpack.c.b16 %v1141_v28, %v1141_v28 }
 0xbd6   :  { %v1135_v30 = vpop.f32.mrf.mxu2 }
 0xbd7   :  { %v1136_v26 = vadd.f32 %v2274_v22, %v1135_v30  ;;  %1257 = vrot.lane.b32.xlu0 %v3004_v29, %s2601_s29  ;;  %1259 = vrot.lane.b32.xlu1 %v3004_v29, %s2600_s6 }
 0xbd8   :  { %1143 = vrot.lane.b32.xlu2 %v3004_v29, %s2599_s27 }
 0xbd9   :  { %v1139_v51 = vpack.c.bf16 %v1136_v26, %v1136_v26 }
 0xbdb   :  { %v1165_v31 = vunpack.c.l.b16 %v1139_v51 }
 0xbdd   :  { %v3012_v32 = vpack.c.b16 %v1165_v31, %v1165_v31 }
 0xbdf   :  { %1282 = vrot.lane.b32.xlu0 %v3012_v32, %s2600_s6 }
 0xbe0   :  { %1167 = vrot.lane.b32.xlu2 %v3012_v32, %s2599_s27 }
 0xbe8   :  { %1280 = vrot.lane.b32.xlu2 %v3012_v32, %s2601_s29  ;;  %s3252_s29 = smov 40  }
 0xc32   :  { %v1144_v33 = vpop.permute.xlu2 %1143 }
 0xc33   :  { %v1149_v34 = vsel %vm323_vm8, %v1144_v33, 0 }
 0xc34   :  { %1158 = vmatpush.bf16.xpose.msra.mxu3 %v1149_v34 }
 0xc3a   :  { %v1168_v52 = vpop.permute.xlu2 %1167 }
 0xc3b   :  { %v1173_v35 = vsel %vm323_vm8, %v1168_v52, 0  ;;  %2134 = vmatmul.msk.bf16.vlgmr.msra.gmra.mxu3 %vm323_vm8, %v1138_v25  ;;  %v2143_v25 = vld [vmem:[%s3250_s17 + $0x14] sm:$0xf] }
 0xc3c   :  { %1182 = vmatpush.bf16.xpose.msra.mxu0 %v1173_v35  ;;  %v1376_v28 = vsel %vm396_vm9, %v2143_v25, 0 }
 0xc42   :  { %v1281_v41 = vpop.permute.xlu2 %1280 }
 0xc43   :  { %2135 = vmatmul.msk.bf16.vlgmr.msra.gmra.mxu0 %vm323_vm8, %v1139_v51 }
 0xc49   :  { %v1258_v36 = vpop.permute.xlu0 %1257  ;;  %v1260_v37 = vpop.permute.xlu1 %1259 }
 0xc4a   :  { %v1265_v38 = vsel %vm323_vm8, %v1260_v37, 0 }
 0xc4b   :  { %1274 = vmatpush.bf16.xpose.msrb.mxu3 %v1265_v38 }
 0xc51   :  { %v1283_v39 = vpop.permute.xlu0 %1282 }
 0xc52   :  { %v1288_v40 = vsel %vm323_vm8, %v1283_v39, 0  ;;  %2139 = vmatmul.msk.bf16.vlgmr.msrb.gmra.mxu3 %vm323_vm8, %v1258_v36 }
 0xc53   :  { %1297 = vmatpush.bf16.xpose.msrb.mxu0 %v1288_v40  ;;  %1385 = vmatpush.bf16.msra.mxu3 %v1376_v28 }
 0xc5a   :  { %2140 = vmatmul.msk.bf16.vlgmr.msrb.gmra.mxu0 %vm323_vm8, %v1281_v41 }
 0xcbe   :  { %v1160_v42 = vpop.f32.mrf.mxu3 }
 0xcbf   :  { %v1161_v43 = vadd.f32 %v1160_v42, %v2834_v17 }
 0xcc0   :  { %v1184_v44 = vpop.f32.mrf.mxu0 }
 0xcc1   :  { %v1188_v45 = vsel %vm323_vm8, %v1161_v43, -inf  ;;  %v1185_v0 = vadd.f32 %v1184_v44, %v2842_v27 }
 0xcc2   :  { %1189 = vmax.xlane.f32.xlu1 %v1188_v45 }
 0xcc3   :  { %v1191_v6 = vsel %vm323_vm8, %v1185_v0, -inf }
 0xcc6   :  { %v1162_v46 = vpop.f32.mrf.mxu3 }
 0xcc8   :  { %v1186_v47 = vpop.f32.mrf.mxu0 }
 0xcd5   :  { %v1276_v48 = vpop.f32.mrf.mxu3 }
 0xcd6   :  { %v1277_v59 = vadd.f32 %v1276_v48, %v2834_v17 }
 0xcd7   :  { %v1299_v49 = vpop.f32.mrf.mxu0 }
 0xcd8   :  { %v1303_v50 = vsel %vm323_vm8, %v1277_v59, -inf  ;;  %v1300_v3 = vadd.f32 %v1299_v49, %v2842_v27 }
 0xcd9   :  { %1304 = vmax.xlane.f32.xlu0 %v1303_v50 }
 0xcda   :  { %v1306_v7 = vsel %vm323_vm8, %v1300_v3, -inf }
 0xcdb   :  { %1212 = vrot.lane.b32.xlu1 %v3004_v29, %s2596_s23 }
 0xcdd   :  { %v1278_v53 = vpop.f32.mrf.mxu3 }
 0xcdf   :  { %v1301_v54 = vpop.f32.mrf.mxu0 }
 0xce3   :  { %1412 = vrot.lane.b32.xlu1 %v3004_v29, %s2604_s14 }
 0xd35   :  { %v1190_v55 = vpop.xlane.xlu1 %1189 }
 0xd36   :  { %v1194_v56 = vsub.f32 %v1161_v43, %v1190_v55 }
 0xd38   :  { %v1196_v57 = vmul.f32 1.442695, %v1194_v56 }
 0xd3a   :  { %2336 = vpow2.f32 %v1196_v57 }
 0xd40   :  { %v2337_v58 = vpop.eup %2336 }
 0xd41   :  { %v1200_v60 = vsel %vm323_vm8, %v2337_v58, 0.0 }
 0xd42   :  { %1201 = vadd.xlane.f32.xlu2 %v1200_v60 }
 0xd4c   :  { %v1305_v61 = vpop.xlane.xlu0 %1304 }
 0xd4d   :  { %v1309_v62 = vsub.f32 %v1277_v59, %v1305_v61  ;;  %v1213_v63 = vpop.permute.xlu1 %1212 }
 0xd4e   :  { %v1218_v1 = vsel %vm396_vm9, %v1213_v63, 0 }
 0xd4f   :  { %v1311_v2 = vmul.f32 1.442695, %v1309_v62  ;;  %1227 = vmatpush.bf16.msra.mxu1 %v1218_v1 }
 0xd51   :  { %2338 = vpow2.f32 %v1311_v2 }
 0xd55   :  { %v1413_v24 = vpop.permute.xlu1 %1412 }
 0xd57   :  { %v2339_v4 = vpop.eup %2338 }
 0xd58   :  { %v1315_v5 = vsel %vm323_vm8, %v2339_v4, 0.0 }
 0xd59   :  { %1316 = vadd.xlane.f32.xlu0 %v1315_v5 }
 0xd5a   :  { %1327 = vrot.lane.b32.xlu2 %v3004_v29, %s2602_s7 }
 0xd6d   :  { %1414 = vrot.lane.b32.xlu0 %v3004_v29, %s2603_s3 }
 0xd83   :  { %1192 = vmax.xlane.f32.xlu2 %v1191_v6 }
 0xd97   :  { %1307 = vmax.xlane.f32.xlu0 %v1306_v7 }
 0xd9b   :  { %1233 = vrot.lane.b32.xlu2 %v3012_v32, %s2596_s23 }
 0xda3   :  { %1435 = vrot.lane.b32.xlu2 %v3012_v32, %s2604_s14 }
 0xdab   :  { %1482 = vrot.lane.b32.xlu2 %v3004_v29, %s2605_s12 }
 0xdb3   :  { %1551 = vrot.lane.b32.xlu2 %v3004_v29, %s2606_s25 }
 0xdb5   :  { %v1202_v8 = vpop.xlane.xlu2 %1201 }
 0xdb6   :  { %2340 = vrcp.f32 %v1202_v8  ;;  %v2138_v8 = vld [vmem:[%s3250_s17 + $0x10] sm:$0xf] }
 0xdbb   :  { %1574 = vrot.lane.b32.xlu2 %v3012_v32, %s2606_s25 }
 0xdbc   :  { %v2341_v9 = vpop.eup %2340 }
 0xdbd   :  { %v1208_v10 = vmul.f32 %v2341_v9, %v2337_v58  ;;  %v1328_v11 = vpop.permute.xlu2 %1327  ;;  %v1396_v9 = vsel %vm396_vm9, %v2138_v8, 0 }
 0xdbe   :  { %v1333_v13 = vsel %vm396_vm9, %v1328_v11, 0  ;;  %1405 = vmatpush.bf16.msra.mxu0 %v1396_v9 }
 0xdbf   :  { %v1210_v14 = vpack.c.bf16 %v1208_v10, %v1208_v10  ;;  %1342 = vmatpush.bf16.msrb.mxu1 %v1333_v13 }
 0xdc1   :  { %2136 = vmatmul.msk.bf16.vlgmr.msra.gmra.mxu1 %vm323_vm8, %v1210_v14 }
 0xdc3   :  { %1549 = vrot.lane.b32.xlu2 %v3004_v29, %s2607_s4 }
 0xdcb   :  { %1572 = vrot.lane.b32.xlu2 %v3012_v32, %s2607_s4 }
 0xdcc   :  { %v1317_v15 = vpop.xlane.xlu0 %1316 }
 0xdcd   :  { %2342 = vrcp.f32 %v1317_v15 }
 0xdd3   :  { %v2343_v16 = vpop.eup %2342 }
 0xdd4   :  { %v1323_v18 = vmul.f32 %v2343_v16, %v2339_v4 }
 0xdd6   :  { %v1325_v21 = vpack.c.bf16 %v1323_v18, %v1323_v18 }
 0xdd8   :  { %2141 = vmatmul.msk.bf16.vlgmr.msrb.gmra.mxu1 %vm323_vm8, %v1325_v21 }
 0xddf   :  { %v1415_v22 = vpop.permute.xlu0 %1414 }
 0xde0   :  { %v1420_v23 = vsel %vm323_vm8, %v1415_v22, 0 }
 0xde1   :  { %1429 = vmatpush.bf16.xpose.msra.mxu1 %v1420_v23 }
 0xde8   :  { %2146 = vmatmul.msk.bf16.vlgmr.msra.gmra.mxu1 %vm323_vm8, %v1413_v24 }
 0xdf6   :  { %v1193_v30 = vpop.xlane.xlu2 %1192 }
 0xdf7   :  { %v1195_v26 = vsub.f32 %v1185_v0, %v1193_v30 }
 0xdf9   :  { %v1198_v51 = vmul.f32 1.442695, %v1195_v26 }
 0xdfb   :  { %2344 = vpow2.f32 %v1198_v51 }
 0xdfe   :  { %v1234_v31 = vpop.permute.xlu2 %1233 }
 0xdff   :  { %v1239_v33 = vsel %vm396_vm9, %v1234_v31, 0 }
 0xe00   :  { %1248 = vmatpush.bf16.msra.mxu2 %v1239_v33 }
 0xe01   :  { %v2345_v34 = vpop.eup %2344 }
 0xe02   :  { %v1203_v52 = vsel %vm323_vm8, %v2345_v34, 0.0 }
 0xe03   :  { %1204 = vadd.xlane.f32.xlu1 %v1203_v52 }
 0xe06   :  { %v1436_v35 = vpop.permute.xlu2 %1435 }
 0xe0a   :  { %v1308_v36 = vpop.xlane.xlu0 %1307 }
 0xe0b   :  { %v1310_v37 = vsub.f32 %v1300_v3, %v1308_v36 }
 0xe0d   :  { %v1313_v38 = vmul.f32 1.442695, %v1310_v37 }
 0xe0e   :  { %v1483_v39 = vpop.permute.xlu2 %1482 }
 0xe0f   :  { %2346 = vpow2.f32 %v1313_v38  ;;  %v1488_v40 = vsel %vm396_vm9, %v1483_v39, 0 }
 0xe10   :  { %1497 = vmatpush.bf16.msrb.mxu3 %v1488_v40 }
 0xe15   :  { %v2347_v41 = vpop.eup %2346 }
 0xe16   :  { %v1318_v42 = vsel %vm323_vm8, %v2347_v41, 0.0  ;;  %v1552_v63 = vpop.permute.xlu2 %1551 }
 0xe17   :  { %1319 = vadd.xlane.f32.xlu0 %v1318_v42  ;;  %v1557_v4 = vsel %vm323_vm8, %v1552_v63, 0 }
 0xe1c   :  { %1348 = vrot.lane.b32.xlu1 %v3012_v32, %s2602_s7 }
 0xe1e   :  { %v1575_v5 = vpop.permute.xlu2 %1574 }
 0xe1f   :  { %v1580_v21 = vsel %vm323_vm8, %v1575_v5, 0 }
 0xe26   :  { %v1550_v0 = vpop.permute.xlu2 %1549 }
 0xe2b   :  { %1437 = vrot.lane.b32.xlu0 %v3012_v32, %s2603_s3 }
 0xe2e   :  { %v1573_v38 = vpop.permute.xlu2 %1572 }
 0xe3e   :  { %v1229_v43 = vpop.f32.mrf.mxu1 }
 0xe46   :  { %v1231_v44 = vpop.f32.mrf.mxu1 }
 0xe55   :  { %v1344_v45 = vpop.f32.mrf.mxu1 }
 0xe5d   :  { %v1346_v46 = vpop.f32.mrf.mxu1 }
 0xe65   :  { %v1431_v47 = vpop.f32.mrf.mxu1 }
 0xe66   :  { %v1432_v48 = vadd.f32 %v1431_v47, %v2834_v17 }
 0xe68   :  { %v1458_v59 = vsel %vm323_vm8, %v1432_v48, -inf }
 0xe69   :  { %1459 = vmax.xlane.f32.xlu1 %v1458_v59 }
 0xe6d   :  { %v1433_v49 = vpop.f32.mrf.mxu1 }
 0xe76   :  { %v1205_v50 = vpop.xlane.xlu1 %1204 }
 0xe77   :  { %2348 = vrcp.f32 %v1205_v50 }
 0xe7d   :  { %v2349_v53 = vpop.eup %2348 }
 0xe7e   :  { %v1209_v54 = vmul.f32 %v2349_v53, %v2345_v34 }
 0xe80   :  { %v1211_v55 = vpack.c.bf16 %v1209_v54, %v1209_v54 }
 0xe82   :  { %2137 = vmatmul.msk.bf16.vlgmr.msra.gmra.mxu2 %vm323_vm8, %v1211_v55 }
 0xe8a   :  { %v1320_v56 = vpop.xlane.xlu0 %1319 }
 0xe8b   :  { %2350 = vrcp.f32 %v1320_v56 }
 0xe8e   :  { %v1349_v57 = vpop.permute.xlu1 %1348 }
 0xe8f   :  { %v1354_v58 = vsel %vm396_vm9, %v1349_v57, 0 }
 0xe90   :  { %1363 = vmatpush.bf16.msrb.mxu2 %v1354_v58 }
 0xe91   :  { %v2351_v60 = vpop.eup %2350 }
 0xe92   :  { %v1324_v61 = vmul.f32 %v2351_v60, %v2347_v41  ;;  %v2150_v60 = vld [vmem:[%s3250_s17 + $0x18] sm:$0xf] }
 0xe94   :  { %v1326_v62 = vpack.c.bf16 %v1324_v61, %v1324_v61  ;;  %v1531_v61 = vsel %vm396_vm9, %v2150_v60, 0 }
 0xe95   :  { %1540 = vmatpush.bf16.msrb.mxu1 %v1531_v61  ;;  %v2229_v61 = vld [vmem:[%s3215_s11 + $0x10] sm:$0xff] }
 0xe96   :  { %2142 = vmatmul.msk.bf16.vlgmr.msrb.gmra.mxu2 %vm323_vm8, %v1326_v62 }
 0xe9d   :  { %v1438_v1 = vpop.permute.xlu0 %1437 }
 0xe9e   :  { %v1443_v2 = vsel %vm323_vm8, %v1438_v1, 0 }
 0xe9f   :  { %1452 = vmatpush.bf16.xpose.msra.mxu2 %v1443_v2 }
 0xea6   :  { %2147 = vmatmul.msk.bf16.vlgmr.msra.gmra.mxu2 %vm323_vm8, %v1436_v35 }
 0xea7   :  { %1566 = vmatpush.bf16.xpose.msrb.mxu2 %v1557_v4 }
 0xeb6   :  { %2152 = vmatmul.msk.bf16.vlgmr.msrb.gmra.mxu2 %vm323_vm8, %v1550_v0 }
 0xedc   :  { %v1460_v6 = vpop.xlane.xlu1 %1459 }
 0xedd   :  { %v1464_v3 = vsub.f32 %v1432_v48, %v1460_v6 }
 0xedf   :  { %v1466_v7 = vmul.f32 1.442695, %v1464_v3 }
 0xee1   :  { %2352 = vpow2.f32 %v1466_v7 }
 0xee7   :  { %v2353_v10 = vpop.eup %2352 }
 0xee8   :  { %v1470_v11 = vsel %vm323_vm8, %v2353_v10, 0.0 }
 0xee9   :  { %1471 = vadd.xlane.f32.xlu0 %v1470_v11 }
 0xefd   :  { %1503 = vrot.lane.b32.xlu0 %v3012_v32, %s2605_s12 }
 0xf05   :  { %v1250_v13 = vpop.f32.mrf.mxu2 }
 0xf06   :  { %v1254_v14 = vpack.c.bf16 %v1250_v13, %v1229_v43 }
 0xf08   :  { %2145 = vmatmul.msk.bf16.vlgmr.msra.gmra.mxu0 %vm323_vm8, %v1254_v14 }
 0xf0d   :  { %v1252_v15 = vpop.f32.mrf.mxu2 }
 0xf19   :  { %v1365_v16 = vpop.f32.mrf.mxu2 }
 0xf1a   :  { %v1369_v18 = vpack.c.bf16 %v1365_v16, %v1344_v45 }
 0xf1c   :  { %2144 = vmatmul.msk.bf16.vlgmr.msra.gmra.mxu3 %vm323_vm8, %v1369_v18 }
 0xf1d   :  { %1589 = vmatpush.bf16.xpose.msra.mxu3 %v1580_v21 }
 0xf21   :  { %v1367_v22 = vpop.f32.mrf.mxu2 }
 0xf29   :  { %v1454_v23 = vpop.f32.mrf.mxu2 }
 0xf2a   :  { %v1455_v24 = vadd.f32 %v1454_v23, %v2842_v27 }
 0xf2c   :  { %v1461_v25 = vsel %vm323_vm8, %v1455_v24, -inf }
 0xf2d   :  { %1462 = vmax.xlane.f32.xlu1 %v1461_v25 }
 0xf31   :  { %v1456_v28 = vpop.f32.mrf.mxu2 }
 0xf32   :  { %v2156_v28 = vld [vmem:[%s3250_s17 + $0x1c] sm:$0xf]  ;;  %s3253_s17 = sld [smem:[#allocation24_spill]] }
 0xf39   :  { %v1568_v30 = vpop.f32.mrf.mxu2 }
 0xf3a   :  { %v1569_v26 = vadd.f32 %v1568_v30, %v2834_v17  ;;  %v1668_v30 = vsel %vm396_vm9, %v2156_v28, 0  ;;  %v2233_v28 = vld [vmem:[%s3217_s13 + $0x30] sm:$0xff] }
 0xf3b   :  { %1677 = vmatpush.bf16.msra.mxu2 %v1668_v30  ;;  %v2232_v30 = vld [vmem:[%s3217_s13 + $0x28] sm:$0xff] }
 0xf3c   :  { %v1595_v51 = vsel %vm323_vm8, %v1569_v26, -inf }
 0xf3d   :  { %1596 = vmax.xlane.f32.xlu1 %v1595_v51 }
 0xf41   :  { %v1570_v31 = vpop.f32.mrf.mxu2 }
 0xf5c   :  { %v1472_v33 = vpop.xlane.xlu0 %1471 }
 0xf5d   :  { %2354 = vrcp.f32 %v1472_v33 }
 0xf63   :  { %v2355_v34 = vpop.eup %2354 }
 0xf64   :  { %v1478_v52 = vmul.f32 %v2355_v34, %v2353_v10 }
 0xf66   :  { %v1480_v35 = vpack.c.bf16 %v1478_v52, %v1478_v52 }
 0xf68   :  { %2148 = vmatmul.msk.bf16.vlgmr.msrb.gmra.mxu3 %vm323_vm8, %v1480_v35  ;;  %v2275_v35 = vld [vmem:[%s3251_s5 + $0x1] ss:$0 sm:$0xff] }
 0xf6f   :  { %v1504_v36 = vpop.permute.xlu0 %1503 }
 0xf70   :  { %v1509_v37 = vsel %vm396_vm9, %v1504_v36, 0 }
 0xf71   :  { %1518 = vmatpush.bf16.msrb.mxu0 %v1509_v37 }
 0xf78   :  { %2153 = vmatmul.msk.bf16.vlgmr.msra.gmra.mxu3 %vm323_vm8, %v1573_v38 }
 0xf85   :  { %v1407_v39 = vpop.f32.mrf.mxu0 }
 0xf8d   :  { %v1409_v7 = vpop.f32.mrf.mxu0 }
 0xf9f   :  { %v1387_v17 = vpop.f32.mrf.mxu3 }
 0xfa0   :  { %v3104_v40 = vadd.f32 %v1407_v39, %v1387_v17  ;;  %v1463_v41 = vpop.xlane.xlu1 %1462 }
 0xfa1   :  { %v1465_v42 = vsub.f32 %v1455_v24, %v1463_v41 }
 0xfa3   :  { %v1468_v43 = vmul.f32 1.442695, %v1465_v42 }
 0xfa5   :  { %2356 = vpow2.f32 %v1468_v43 }
 0xfa7   :  { %v3110_v50 = vpop.f32.mrf.mxu3 }
 0xfa8   :  { %v1410_v39 = vadd.f32 %v1409_v7, %v3110_v50 }
 0xfab   :  { %v2357_v44 = vpop.eup %2356 }
 0xfac   :  { %v1473_v45 = vsel %vm323_vm8, %v2357_v44, 0.0 }
 0xfad   :  { %1474 = vadd.xlane.f32.xlu2 %v1473_v45 }
 0xfb0   :  { %v1597_v46 = vpop.xlane.xlu1 %1596 }
 0xfb1   :  { %v1601_v47 = vsub.f32 %v1569_v26, %v1597_v46 }
 0xfb3   :  { %v1603_v48 = vmul.f32 1.442695, %v1601_v47 }
 0xfb5   :  { %2358 = vpow2.f32 %v1603_v48 }
 0xfbb   :  { %v2359_v59 = vpop.eup %2358 }
 0xfbc   :  { %v1607_v49 = vsel %vm323_vm8, %v2359_v59, 0.0 }
 0xfbd   :  { %1608 = vadd.xlane.f32.xlu0 %v1607_v49 }
 0xfc5   :  { %1640 = vrot.lane.b32.xlu2 %v3012_v32, %s3252_s29 }
 0xfeb   :  { %v1499_v53 = vpop.f32.mrf.mxu3 }
 0xff3   :  { %v1501_v54 = vpop.f32.mrf.mxu3 }
 0xffb   :  { %v1591_v55 = vpop.f32.mrf.mxu3 }
 0xffc   :  { %v1592_v56 = vadd.f32 %v1591_v55, %v2842_v27 }
 0xffe   :  { %v1598_v57 = vsel %vm323_vm8, %v1592_v56, -inf }
 0xfff   :  { %1599 = vmax.xlane.f32.xlu1 %v1598_v57 }
0x1003   :  { %v1593_v58 = vpop.f32.mrf.mxu3 }
0x1020   :  { %v1475_v62 = vpop.xlane.xlu2 %1474 }
0x1021   :  { %2360 = vrcp.f32 %v1475_v62 }
0x1027   :  { %v2361_v32 = vpop.eup %2360 }
0x1028   :  { %v1479_v63 = vmul.f32 %v2361_v32, %v2357_v44  ;;  %v1641_v1 = vpop.permute.xlu2 %1640 }
0x1029   :  { %v1646_v2 = vsel %vm396_vm9, %v1641_v1, 0 }
0x102a   :  { %v1481_v4 = vpack.c.bf16 %v1479_v63, %v1479_v63  ;;  %1655 = vmatpush.bf16.msra.mxu1 %v1646_v2 }
0x102c   :  { %2149 = vmatmul.msk.bf16.vlgmr.msrb.gmra.mxu0 %vm323_vm8, %v1481_v4 }
0x1030   :  { %v1609_v16 = vpop.xlane.xlu0 %1608 }
0x1072   :  { %v1600_v27 = vpop.xlane.xlu1 %1599 }
0x1073   :  { %v1602_v5 = vsub.f32 %v1592_v56, %v1600_v27 }
0x1075   :  { %v1605_v0 = vmul.f32 1.442695, %v1602_v5 }
0x1077   :  { %2362 = vpow2.f32 %v1605_v0 }
0x107d   :  { %v2363_v6 = vpop.eup %2362 }
0x107e   :  { %v1610_v3 = vsel %vm323_vm8, %v2363_v6, 0.0 }
0x107f   :  { %1611 = vadd.xlane.f32.xlu1 %v1610_v3 }
0x1098   :  { %1619 = vrot.lane.b32.xlu1 %v3004_v29, %s3252_s29 }
0x10a9   :  { %v1520_v8 = vpop.f32.mrf.mxu0 }
0x10aa   :  { %v1524_v9 = vpack.c.bf16 %v1520_v8, %v1499_v53 }
0x10ac   :  { %2151 = vmatmul.msk.bf16.vlgmr.msrb.gmra.mxu1 %vm323_vm8, %v1524_v9 }
0x10b1   :  { %v1522_v10 = vpop.f32.mrf.mxu0 }
0x10f2   :  { %v1612_v11 = vpop.xlane.xlu1 %1611 }
0x10f3   :  { %2364 = vrcp.f32 %v1612_v11  ;;  %v2276_v11 = vld [vmem:[%s3213_s9 + $0x1] ss:$0 sm:$0xff] }
0x10f4   :  { %2366 = vrcp.f32 %v1609_v16  ;;  %v2277_v16 = vld [vmem:[#allocation9 + $0x1] ss:$0 sm:$0xff] }
0x10f9   :  { %v2365_v13 = vpop.eup %2364 }
0x10fa   :  { %v1616_v14 = vmul.f32 %v2365_v13, %v2363_v6  ;;  %v2367_v18 = vpop.eup %2366 }
0x10fb   :  { %v1615_v21 = vmul.f32 %v2367_v18, %v2359_v59 }
0x10fc   :  { %v1618_v15 = vpack.c.bf16 %v1616_v14, %v1616_v14 }
0x10fd   :  { %v1617_v23 = vpack.c.bf16 %v1615_v21, %v1615_v21 }
0x10fe   :  { %2155 = vmatmul.msk.bf16.vlgmr.msra.gmra.mxu1 %vm323_vm8, %v1618_v15 }
0x110a   :  { %v1620_v22 = vpop.permute.xlu1 %1619 }
0x110b   :  { %v1625_v29 = vsel %vm396_vm9, %v1620_v22, 0 }
0x110c   :  { %1634 = vmatpush.bf16.msra.mxu0 %v1625_v29 }
0x110f   :  { %2154 = vmatmul.msk.bf16.vlgmr.msra.gmra.mxu0 %vm323_vm8, %v1617_v23 }
0x1129   :  { %v1542_v24 = vpop.f32.mrf.mxu1 }
0x112a   :  { %v1547_v25 = vadd.f32 %v1542_v24, %v3104_v40 }
0x1131   :  { %v1544_v26 = vpop.f32.mrf.mxu1 }
0x1132   :  { %v1548_v40 = vadd.f32 %v1544_v26, %v1410_v39  ;;  %v2278_v26 = vld [vmem:[#allocation11 + $0x1] ss:$0 sm:$0xff] }
0x117b   :  { %v1657_v51 = vpop.f32.mrf.mxu1 }
0x1183   :  { %v1659_v31 = vpop.f32.mrf.mxu1 }
0x1184   :  { %v2231_v31 = vld [vmem:[%s3217_s13 + $0x20] sm:$0xff] }
0x118c   :  { %v1636_v33 = vpop.f32.mrf.mxu0 }
0x118d   :  { %v1661_v34 = vpack.c.bf16 %v1657_v51, %v1636_v33 }
0x118f   :  { %2157 = vmatmul.msk.bf16.vlgmr.msra.gmra.mxu2 %vm323_vm8, %v1661_v34 }
0x1194   :  { %v1638_v52 = vpop.f32.mrf.mxu0 }
0x1212   :  { %v1679_v36 = vpop.f32.mrf.mxu2 }
0x1213   :  { %v1684_v37 = vadd.f32 %v1679_v36, %v1547_v25  ;;  %v2234_v25 = vld [vmem:[%s3217_s13 + $0x38] sm:$0xff] }
0x1214   :  { %1857 = vmatpush.bf16.msrb.mxu0 %v2234_v25  ;;  %v2280_v25 = vld [vmem:[#allocation14 + $0x1] ss:$0 sm:$0xff] }
0x1215   :  { %v1691_v38 = vadd.f32 %v2275_v35, %v1684_v37 }
0x1217   :  { %v1693_v17 = vadd.f32 %v1691_v38, %v2994_v19 }
0x1218   :  { %1858 = vmatpush.bf16.msrb.mxu0 %v2233_v28 }
0x1219   :  { %v1699_v41 = vsel %vm207_vm0, %v1693_v17, 0.0 }
0x121a   :  { %1700 = vadd.xlane.f32.xlu1 %v1699_v41  ;;  %v1681_v42 = vpop.f32.mrf.mxu2 }
0x121b   :  { %v1685_v43 = vadd.f32 %v1681_v42, %v1548_v40 }
0x121c   :  { %1859 = vmatpush.bf16.msrb.mxu0 %v2232_v30 }
0x121d   :  { %v1692_v44 = vadd.f32 %v2275_v35, %v1685_v43 }
0x121f   :  { %v1694_v45 = vadd.f32 %v1692_v44, %v2996_v20  ;;  %v2230_v20 = vld [vmem:[%s3215_s11 + $0x18] sm:$0xff] }
0x1220   :  { %1785 = vmatpush.bf16.msrb.mxu3 %v2230_v20  ;;  %1860 = vmatpush.bf16.msrb.mxu0 %v2231_v31 }
0x1221   :  { %v1702_v46 = vsel %vm207_vm0, %v1694_v45, 0.0 }
0x1222   :  { %1703 = vadd.xlane.f32.xlu0 %v1702_v46 }
0x1224   :  { %1786 = vmatpush.bf16.msrb.mxu3 %v2229_v61 }
0x128d   :  { %v1701_v47 = vpop.xlane.xlu1 %1700 }
0x128e   :  { %v1705_v48 = vmul.f32 %v1701_v47, %v2780_v12 }
0x1290   :  { %v1707_v59 = vsub.f32 %v1693_v17, %v1705_v48 }
0x1292   :  { %v1709_v49 = vmul.f32 %v1707_v59, %v1707_v59 }
0x1294   :  { %v1711_v50 = vsel %vm207_vm0, %v1709_v49, 0.0 }
0x1295   :  { %1712 = vadd.xlane.f32.xlu2 %v1711_v50  ;;  %v1704_v19 = vpop.xlane.xlu0 %1703 }
0x1296   :  { %v1706_v53 = vmul.f32 %v1704_v19, %v2780_v12 }
0x1298   :  { %v1708_v54 = vsub.f32 %v1694_v45, %v1706_v53 }
0x129a   :  { %v1710_v55 = vmul.f32 %v1708_v54, %v1708_v54 }
0x129c   :  { %v1714_v56 = vsel %vm207_vm0, %v1710_v55, 0.0 }
0x129d   :  { %1715 = vadd.xlane.f32.xlu0 %v1714_v56 }
0x1308   :  { %v1713_v57 = vpop.xlane.xlu2 %1712 }
0x1309   :  { %v1717_v58 = vmul.f32 %v1713_v57, %v2780_v12 }
0x130b   :  { %v1719_v60 = vadd.f32 1e-05, %v1717_v58 }
0x130d   :  { %2368 = vrsqrt.f32 %v1719_v60  ;;  %vm1727_vm9 = vweird.f32 %v1719_v60 }
0x1310   :  { %v1716_v62 = vpop.xlane.xlu0 %1715 }
0x1311   :  { %v1718_v32 = vmul.f32 %v1716_v62, %v2780_v12 }
0x1313   :  { %v2369_v63 = vpop.eup %2368  ;;  %v1720_v1 = vadd.f32 1e-05, %v1718_v32 }
0x1314   :  { %v1722_v2 = vmul.f32 %v2369_v63, %v1719_v60  ;;  %vm1728_vm8 = vweird.f32 %v2369_v63 }
0x1315   :  { %2370 = vrsqrt.f32 %v1720_v1  ;;  %vm1729_vm10 = vmor %vm1727_vm9, %vm1728_vm8  ;;  %vm1737_vm12 = vweird.f32 %v1720_v1 }
0x1316   :  { %v1723_v4 = vmul.f32 %v2369_v63, %v1722_v2 }
0x1318   :  { %v1724_v27 = vmul.f32 0.5, %v1723_v4 }
0x131a   :  { %v1725_v5 = vsub.f32 1.5, %v1724_v27 }
0x131b   :  { %v2371_v0 = vpop.eup %2370 }
0x131c   :  { %v1726_v6 = vmul.f32 %v2369_v63, %v1725_v5  ;;  %v1732_v3 = vmul.f32 %v2371_v0, %v1720_v1  ;;  %vm1738_vm11 = vweird.f32 %v2371_v0 }
0x131d   :  { %vm1739_vm13 = vmor %vm1737_vm12, %vm1738_vm11 }
0x131e   :  { %v1733_v7 = vmul.f32 %v2371_v0, %v1732_v3  ;;  %v1730_v8 = vsel %vm1729_vm10, %v2369_v63, %v1726_v6 }
0x131f   :  { %v1741_v13 = vmul.f32 %v1730_v8, %v1707_v59 }
0x1320   :  { %v1734_v9 = vmul.f32 0.5, %v1733_v7 }
0x1321   :  { %v1746_v18 = vmul.f32 %v2276_v11, %v1741_v13 }
0x1322   :  { %v1735_v10 = vsub.f32 1.5, %v1734_v9  ;;  %v2236_v9 = vld [vmem:[#allocation15 + $0x8] sm:$0xff] }
0x1323   :  { %v1751_v29 = vadd.f32 %v2277_v16, %v1746_v18  ;;  %1966 = vmatpush.bf16.msrb.mxu1 %v2236_v9 }
0x1324   :  { %v1736_v14 = vmul.f32 %v2371_v0, %v1735_v10  ;;  %v2235_v10 = vld [vmem:[#allocation15] sm:$0xff] }
0x1326   :  { %v1740_v15 = vsel %vm1739_vm13, %v2371_v0, %v1736_v14 }
0x1327   :  { %v1742_v21 = vmul.f32 %v1740_v15, %v1708_v54  ;;  %v2279_v54 = vld [vmem:[#allocation12 + $0x1] ss:$0 sm:$0xff]  ;;  %1967 = vmatpush.bf16.msrb.mxu1 %v2235_v10 }
0x1329   :  { %v1747_v22 = vmul.f32 %v2276_v11, %v1742_v21 }
0x132b   :  { %v1752_v23 = vadd.f32 %v2277_v16, %v1747_v22 }
0x132d   :  { %v1753_v24 = vpack.c.bf16 %v1752_v23, %v1751_v29 }
0x132f   :  { %2172 = vmatmul.msk.bf16.vlgmr.msrb.gmra.mxu3 %vm207_vm0, %v1753_v24 }
0x13b2   :  { %v1788_v51 = vpop.f32.mrf.mxu3 }
0x13b3   :  { %v1789_v33 = vadd.f32 %v2278_v26, %v1788_v51 }
0x13b5   :  { %v1793_v34 = vmul.f32 %v1789_v33, %v1789_v33 }
0x13b7   :  { %v1795_v52 = vmul.f32 %v1793_v34, %v1789_v33 }
0x13b9   :  { %v1797_v35 = vmul.f32 0.044715, %v1795_v52 }
0x13ba   :  { %v1790_v36 = vpop.f32.mrf.mxu3 }
0x13bb   :  { %v1799_v37 = vadd.f32 %v1797_v35, %v1789_v33  ;;  %v1791_v38 = vadd.f32 %v2278_v26, %v1790_v36 }
0x13bd   :  { %v1801_v39 = vmul.f32 0.7978846, %v1799_v37  ;;  %v1794_v17 = vmul.f32 %v1791_v38, %v1791_v38 }
0x13bf   :  { %v1796_v40 = vmul.f32 %v1794_v17, %v1791_v38  ;;  %2372 = vtanh.f32 %v1801_v39 }
0x13c1   :  { %v1798_v41 = vmul.f32 0.044715, %v1796_v40 }
0x13c3   :  { %v1800_v42 = vadd.f32 %v1798_v41, %v1791_v38 }
0x13c5   :  { %v1802_v43 = vmul.f32 0.7978846, %v1800_v42  ;;  %v2373_v44 = vpop.eup %2372 }
0x13c6   :  { %v1805_v45 = vadd.f32 1.0, %v2373_v44 }
0x13c7   :  { %2374 = vtanh.f32 %v1802_v43 }
0x13c8   :  { %v1807_v47 = vmul.f32 0.5, %v1805_v45  ;;  %v2238_v45 = vld [vmem:[%s3223_s19 + $0x8] sm:$0xff] }
0x13c9   :  { %2004 = vmatpush.bf16.msrb.mxu2 %v2238_v45 }
0x13ca   :  { %v1809_v49 = vmul.f32 %v1807_v47, %v1789_v33  ;;  %v2282_v47 = vld [vmem:[%s3222_s18] ss:$0 sm:$0xff] }
0x13cd   :  { %v2375_v46 = vpop.eup %2374 }
0x13ce   :  { %v1806_v48 = vadd.f32 1.0, %v2375_v46  ;;  %v2237_v46 = vld [vmem:[%s3223_s19] sm:$0xff] }
0x13cf   :  { %2005 = vmatpush.bf16.msrb.mxu2 %v2237_v46 }
0x13d0   :  { %v1808_v59 = vmul.f32 0.5, %v1806_v48 }
0x13d2   :  { %v1810_v50 = vmul.f32 %v1808_v59, %v1791_v38 }
0x13d4   :  { %v1811_v19 = vpack.c.bf16 %v1810_v50, %v1809_v49 }
0x13d6   :  { %2197 = vmatmul.msk.bf16.vlgmr.msrb.gmra.mxu0 %vm1022_vm1, %v1811_v19 }
0x1453   :  { %v1862_v53 = vpop.f32.mrf.mxu0 }
0x1454   :  { %v1863_v57 = vadd.f32 %v2279_v54, %v1862_v53  ;;  %v2011_v53 = vld [vmem:[%s3225_s21] sm:$0x7] }
0x1455   :  { %2217 = vmatpush.msk.msra.mxu3 %vm2022_vm6, %v2011_v53 }
0x1456   :  { %v1867_v60 = vadd.f32 %v1863_v57, %v1751_v29  ;;  %v2284_v57 = vld [vmem:[#allocation2] ss:$0 sm:$0xff] }
0x1458   :  { %v1873_v61 = vsel %vm207_vm0, %v1867_v60, 0.0 }
0x145b   :  { %v1864_v55 = vpop.f32.mrf.mxu0 }
0x145c   :  { %v1865_v56 = vadd.f32 %v2279_v54, %v1864_v55  ;;  %v2283_v54 = vld [vmem:[%s3224_s20] ss:$0 sm:$0xff] }
0x145e   :  { %v1868_v20 = vadd.f32 %v1865_v56, %v1752_v23 }
0x1460   :  { %v1876_v58 = vsel %vm207_vm0, %v1868_v20, 0.0 }
0x1461   :  { %1877 = vadd.xlane.f32.xlu0 %v1876_v58  ;;  %v2012_v58 = vld [vmem:[%s3253_s17] sm:$0x3] }
0x1469   :  { %1874 = vadd.xlane.f32.xlu0 %v1873_v61  ;;  %v2285_v61 = vld [vmem:[#allocation3] ss:$0 sm:$0xff] }
0x14d4   :  { %v1878_v62 = vpop.xlane.xlu0 %1877 }
0x14d5   :  { %v1880_v32 = vmul.f32 %v1878_v62, %v2780_v12 }
0x14d7   :  { %v1882_v63 = vsub.f32 %v1868_v20, %v1880_v32 }
0x14d9   :  { %v1884_v1 = vmul.f32 %v1882_v63, %v1882_v63 }
0x14db   :  { %v1888_v2 = vsel %vm207_vm0, %v1884_v1, 0.0 }
0x14dc   :  { %1889 = vadd.xlane.f32.xlu0 %v1888_v2  ;;  %v1875_v4 = vpop.xlane.xlu0 %1874 }
0x14dd   :  { %v1879_v27 = vmul.f32 %v1875_v4, %v2780_v12 }
0x14df   :  { %v1881_v5 = vsub.f32 %v1867_v60, %v1879_v27  ;;  %v2017_v60 = vmul.f32 %v2284_v57, %v2012_v58 }
0x14e1   :  { %v1883_v0 = vmul.f32 %v1881_v5, %v1881_v5 }
0x14e3   :  { %v1885_v6 = vsel %vm207_vm0, %v1883_v0, 0.0 }
0x14e4   :  { %1886 = vadd.xlane.f32.xlu1 %v1885_v6 }
0x154f   :  { %v1890_v3 = vpop.xlane.xlu0 %1889 }
0x1550   :  { %v1892_v7 = vmul.f32 %v1890_v3, %v2780_v12 }
0x1552   :  { %v1894_v8 = vadd.f32 1e-05, %v1892_v7 }
0x1554   :  { %2376 = vrsqrt.f32 %v1894_v8  ;;  %vm1911_vm15 = vweird.f32 %v1894_v8 }
0x1557   :  { %v1887_v11 = vpop.xlane.xlu1 %1886 }
0x1558   :  { %v1891_v13 = vmul.f32 %v1887_v11, %v2780_v12  ;;  %v2281_v12 = vld [vmem:[%s3220_s16 + $0x1] ss:$0 sm:$0xff] }
0x155a   :  { %v2377_v14 = vpop.eup %2376  ;;  %v1893_v15 = vadd.f32 1e-05, %v1891_v13 }
0x155b   :  { %v1906_v16 = vmul.f32 %v2377_v14, %v1894_v8  ;;  %vm1912_vm14 = vweird.f32 %v2377_v14 }
0x155c   :  { %2378 = vrsqrt.f32 %v1893_v15  ;;  %vm1913_vm1 = vmor %vm1911_vm15, %vm1912_vm14  ;;  %vm1901_vm3 = vweird.f32 %v1893_v15 }
0x155d   :  { %v1907_v18 = vmul.f32 %v2377_v14, %v1906_v16 }
0x155f   :  { %v1908_v21 = vmul.f32 0.5, %v1907_v18 }
0x1561   :  { %v1909_v22 = vsub.f32 1.5, %v1908_v21 }
0x1562   :  { %v2379_v29 = vpop.eup %2378 }
0x1563   :  { %v1910_v23 = vmul.f32 %v2377_v14, %v1909_v22  ;;  %v1896_v24 = vmul.f32 %v2379_v29, %v1893_v15  ;;  %vm1902_vm2 = vweird.f32 %v2379_v29 }
0x1564   :  { %vm1903_vm4 = vmor %vm1901_vm3, %vm1902_vm2 }
0x1565   :  { %v1914_v28 = vsel %vm1913_vm1, %v2377_v14, %v1910_v23  ;;  %v1897_v30 = vmul.f32 %v2379_v29, %v1896_v24 }
0x1566   :  { %v1916_v26 = vmul.f32 %v1914_v28, %v1882_v63 }
0x1567   :  { %v1898_v51 = vmul.f32 0.5, %v1897_v30 }
0x1568   :  { %v1921_v31 = vmul.f32 %v2280_v25, %v1916_v26 }
0x1569   :  { %v1899_v33 = vsub.f32 1.5, %v1898_v51 }
0x156a   :  { %v1926_v34 = vadd.f32 %v2281_v12, %v1921_v31 }
0x156b   :  { %v1900_v52 = vmul.f32 %v2379_v29, %v1899_v33 }
0x156c   :  { %v1928_v36 = vpack.c.bf16 %v1926_v34, %v1926_v34 }
0x156d   :  { %v1904_v35 = vsel %vm1903_vm4, %v2379_v29, %v1900_v52 }
0x156e   :  { %v1915_v37 = vmul.f32 %v1904_v35, %v1881_v5  ;;  %v1940_v39 = vunpack.c.l.b16 %v1928_v36 }
0x1570   :  { %v1920_v38 = vmul.f32 %v2280_v25, %v1915_v37  ;;  %v1941_v41 = vrot.slane %v1940_v39, 7 }
0x1572   :  { %v1925_v17 = vadd.f32 %v2281_v12, %v1920_v38 }
0x1574   :  { %v1927_v40 = vpack.c.bf16 %v1925_v17, %v1925_v17 }
0x1576   :  { %v1939_v42 = vunpack.c.l.b16 %v1927_v40 }
0x1578   :  { %v1943_v43 = vsel %vm1942_vm5, %v1941_v41, %v1939_v42 }
0x1579   :  { %v1944_v44 = vpack.c.b16 %v1943_v43, %v1943_v43 }
0x157b   :  { %2207 = vmatmul.msk.bf16.vlgmr.msrb.gmra.mxu1 %vm207_vm0, %v1944_v44 }
0x15f8   :  { %v1969_v48 = vpop.f32.mrf.mxu1 }
0x15f9   :  { %v1970_v59 = vadd.f32 %v2282_v47, %v1969_v48 }
0x15fb   :  { %2380 = vtanh.f32 %v1970_v59 }
0x1600   :  { %v1971_v49 = vpop.f32.mrf.mxu1 }
0x1601   :  { %v2381_v50 = vpop.eup %2380 }
0x1602   :  { %v1974_v19 = vpack.c.bf16 %v2381_v50, %v2381_v50 }
0x1604   :  { %2216 = vmatmul.msk.bf16.vlgmr.msrb.gmra.mxu2 %vm207_vm0, %v1974_v19  ;;  %vm2051_vm0 = vcmask 1024  }
0x1687   :  { %v2007_v55 = vpop.f32.mrf.mxu2 }
0x1688   :  { %v2008_v56 = vadd.f32 %v2283_v54, %v2007_v55 }
0x168a   :  { %2218 = vmatmul.msk.f32.vlgmr.msra.gmra.mxu3 %vm2018_vm7, %v2008_v56 }
0x168f   :  { %v2009_v20 = vpop.f32.mrf.mxu2 }
0x170d   :  { %v2043_v62 = vpop.f32.mrf.mxu3 }
0x170e   :  { %v2044_v32 = vadd.f32 %v2043_v62, %v2017_v60 }
0x1710   :  { %v2050_v63 = vadd.f32 %v2285_v61, %v2044_v32 }
0x1712   :  { %2052 = vst.msk [vmem:[%s3227_s24] sm:$0x3] %vm2051_vm0, %v2050_v63 }
0x1713   :  { %2057 = vsyncpa [#allocation5], 1 }
0x1714   :  { %2058 = vsyncpa [#allocation7], 1 }
0x1715   :  { %2059 = vsyncpa [#allocation10], 1 }
0x1716   :  { %2060 = vsyncpa [#allocation13], 1 }
0x1717   :  { %2061 = vsyncpa [#allocation16], 1 }

</bundles_post_ra>
